<compile_context>
chip_gen: v7x
topology: tpu7x:2x2x1
jax: 0.10.0
libtpu: 0.0.40
codegen_flags: <defaults>
</compile_context>

<pallas_src>
import functools
import math

import jax
import jax.numpy as jnp
from jax import lax
from jax.experimental import pallas as pl
from jax.experimental.pallas import tpu as pltpu

LN_EPS = 1e-12


# ----------------------------- math helpers --------------------------------
def _layernorm(x, gamma, beta):
    mu = jnp.mean(x, axis=-1, keepdims=True)
    var = jnp.mean((x - mu) ** 2, axis=-1, keepdims=True)
    return (x - mu) * jax.lax.rsqrt(var + LN_EPS) * gamma + beta


def _gelu(x):
    # tanh-approximate GELU (BERT "gelu_new"); TODO(synk): reference may use the
    # exact erf form — switch if bit-exact parity with the PyTorch impl is needed.
    c = math.sqrt(2.0 / math.pi)
    return 0.5 * x * (1.0 + jnp.tanh(c * (x + 0.044715 * x * x * x)))


# ----------------------------- BlockSpec helpers ----------------------------
def _full_spec(shape):
    zeros = (0,) * len(shape)
    return pl.BlockSpec(shape, lambda b, _z=zeros: _z)


def _batch_spec(shape):
    rest = (0,) * (len(shape) - 1)
    return pl.BlockSpec(shape, lambda b, _r=rest: (b,) + _r)


# ------------------------------- fused kernel -------------------------------
def fused_bert_kernel(emb_ref, mask_ref,
                      eg_ref, eb_ref,
                      wq_ref, bq_ref, wk_ref, bk_ref, wv_ref, bv_ref,
                      wo_ref, bo_ref, ag_ref, ab_ref,
                      w1_ref, b1_ref, w2_ref, b2_ref, fg_ref, fb_ref,
                      wf_ref, bf_ref,
                      out_ref, score_ref, fit_ref,
                      *, num_layers, num_heads, head_dim):
    # ---- embeddings (sum was done outside; LayerNorm here) ----
    x = _layernorm(emb_ref[0], eg_ref[...], eb_ref[...])            # [S, H]

    mask_add = (1.0 - mask_ref[0]) * -10000.0                       # [1, S] additive key mask
    scale = 1.0 / math.sqrt(head_dim)

    # fit_dense on the embedding output
    fit_ref[0, 0] = (jnp.dot(x, wf_ref[0], preferred_element_type=jnp.float32)
                     + bf_ref[0])

    # ---- transformer layers (static unroll, all weights VMEM-resident) ----
    for l in range(num_layers):
        # -- multi-head self-attention: per-head weight tiles, no slicing /
        #    transpose / concat of activations --
        acc = None
        for h in range(num_heads):
            qh = jnp.dot(x, wq_ref[l, h], preferred_element_type=jnp.float32) + bq_ref[l, h]
            kh = jnp.dot(x, wk_ref[l, h], preferred_element_type=jnp.float32) + bk_ref[l, h]
            vh = jnp.dot(x, wv_ref[l, h], preferred_element_type=jnp.float32) + bv_ref[l, h]

            # scores = qh @ kh^T  via dot_general on the shared head dim (no .T)
            s = lax.dot_general(qh, kh, (((1,), (1,)), ((), ())),
                                preferred_element_type=jnp.float32) * scale
            s = s + mask_add                                         # [S, S]
            score_ref[0, l * num_heads + h] = s                      # post-mask, pre-softmax

            p = jax.nn.softmax(s, axis=-1)
            ctx_h = jnp.dot(p, vh, preferred_element_type=jnp.float32)        # [S, dh]
            # output projection: concat(ctx_h) @ Wo  ==  sum_h ctx_h @ Wo[h]
            contrib = jnp.dot(ctx_h, wo_ref[l, h], preferred_element_type=jnp.float32)
            acc = contrib if acc is None else acc + contrib

        attn_out = acc + bo_ref[l]
        x = _layernorm(x + attn_out, ag_ref[l], ab_ref[l])

        # -- feed-forward network --
        h1 = _gelu(jnp.dot(x, w1_ref[l], preferred_element_type=jnp.float32) + b1_ref[l])
        y = jnp.dot(h1, w2_ref[l], preferred_element_type=jnp.float32) + b2_ref[l]
        x = _layernorm(x + y, fg_ref[l], fb_ref[l])

        # -- fit_dense on this layer's output --
        fit_ref[0, l + 1] = (jnp.dot(x, wf_ref[l + 1], preferred_element_type=jnp.float32)
                             + bf_ref[l + 1])

    out_ref[0] = x


_WEIGHT_ORDER = ("emb_ln_g", "emb_ln_b",
                 "wq", "bq", "wk", "bk", "wv", "bv", "wo", "bo",
                 "attn_ln_g", "attn_ln_b",
                 "w1", "b1", "w2", "b2", "ffn_ln_g", "ffn_ln_b",
                 "fit_w", "fit_b")


def fused_forward_call(emb, attn_mask, params, cfg):
    B, S, H = emb.shape
    L, nH, fit = cfg["num_layers"], cfg["num_heads"], cfg["fit_size"]
    weights = [params[name] for name in _WEIGHT_ORDER]

    kern = functools.partial(fused_bert_kernel,
                             num_layers=L,
                             num_heads=nH,
                             head_dim=cfg["head_dim"])

    return pl.pallas_call(
        kern,
        out_shape=(jax.ShapeDtypeStruct((B, S, H), jnp.float32),
                   jax.ShapeDtypeStruct((B, L * nH, S, S), jnp.float32),
                   jax.ShapeDtypeStruct((B, L + 1, S, fit), jnp.float32)),
        grid=(B,),
        in_specs=[_batch_spec((1, S, H)), _batch_spec((1, 1, S))]
                 + [_full_spec(w.shape) for w in weights],
        out_specs=(_batch_spec((1, S, H)),
                   _batch_spec((1, L * nH, S, S)),
                   _batch_spec((1, L + 1, S, fit))),
        compiler_params=pltpu.CompilerParams(dimension_semantics=("parallel",)),
    )(emb, attn_mask, *weights)


# ------------------------------ parameters ----------------------------------
def init_params(key, cfg):
    H, F, fit = cfg["hidden_size"], cfg["ffn_size"], cfg["fit_size"]
    L, nH, dh = cfg["num_layers"], cfg["num_heads"], cfg["head_dim"]
    keys = iter(jax.random.split(key, 32))

    def nrm(shape):
        return 0.02 * jax.random.normal(next(keys), shape, jnp.float32)

    zeros = lambda shape: jnp.zeros(shape, jnp.float32)
    ones = lambda shape: jnp.ones(shape, jnp.float32)

    return {
        "tok_emb": nrm((cfg["vocab_size"], H)),
        "seg_emb": nrm((cfg["num_segments"], H)),
        "pos_emb": nrm((cfg["max_position"], H)),
        "emb_ln_g": ones((1, H)), "emb_ln_b": zeros((1, H)),
        # attention weights stored per-head: [L, nH, H, dh] / [L, nH, dh, H]
        "wq": nrm((L, nH, H, dh)), "bq": zeros((L, nH, 1, dh)),
        "wk": nrm((L, nH, H, dh)), "bk": zeros((L, nH, 1, dh)),
        "wv": nrm((L, nH, H, dh)), "bv": zeros((L, nH, 1, dh)),
        "wo": nrm((L, nH, dh, H)), "bo": zeros((L, 1, H)),
        "attn_ln_g": ones((L, 1, H)), "attn_ln_b": zeros((L, 1, H)),
        "w1": nrm((L, H, F)), "b1": zeros((L, 1, F)),
        "w2": nrm((L, F, H)), "b2": zeros((L, 1, H)),
        "ffn_ln_g": ones((L, 1, H)), "ffn_ln_b": zeros((L, 1, H)),
        "fit_w": nrm((L + 1, H, fit)), "fit_b": zeros((L + 1, 1, fit)),
    }


# ------------------------------ forward pass ---------------------------------
def tiny_bert_forward(params, token_ids, segment_ids, position_ids, attn_mask, cfg):
    L, nH = cfg["num_layers"], cfg["num_heads"]
    # embedding gathers are plain-JAX glue (data-dependent indexing)
    emb = (jnp.take(params["tok_emb"], token_ids, axis=0)
           + jnp.take(params["seg_emb"], segment_ids, axis=0)
           + jnp.take(params["pos_emb"], position_ids, axis=0))

    output, scores, fits = fused_forward_call(emb, attn_mask, params, cfg)

    all_attn_outputs = [scores[:, l * nH:(l + 1) * nH] for l in range(L)]
    all_ffn_outputs = [fits[:, i] for i in range(L + 1)]
    # TODO(synk): use_lm=True path (BertMaskedLMHead with tied embeddings) not implemented.
    return output, all_attn_outputs, all_ffn_outputs


# ------------------------- plain-JAX reference (check) -----------------------
def reference_forward(params, token_ids, segment_ids, position_ids, attn_mask, cfg):
    L, dh = cfg["num_layers"], cfg["head_dim"]
    hi = jax.lax.Precision.HIGHEST
    x = (jnp.take(params["tok_emb"], token_ids, axis=0)
         + jnp.take(params["seg_emb"], segment_ids, axis=0)
         + jnp.take(params["pos_emb"], position_ids, axis=0))
    x = _layernorm(x, params["emb_ln_g"], params["emb_ln_b"])
    mask_add = ((1.0 - attn_mask) * -10000.0)[:, :, None, :]         # [B,1,1,S]
    scale = 1.0 / math.sqrt(dh)

    fits = [jnp.einsum("bsh,hf->bsf", x, params["fit_w"][0], precision=hi)
            + params["fit_b"][0]]
    attns = []
    for l in range(L):
        q = jnp.einsum("bsh,nhd->bnsd", x, params["wq"][l], precision=hi) + params["bq"][l][None]
        k = jnp.einsum("bsh,nhd->bnsd", x, params["wk"][l], precision=hi) + params["bk"][l][None]
        v = jnp.einsum("bsh,nhd->bnsd", x, params["wv"][l], precision=hi) + params["bv"][l][None]
        s = jnp.einsum("bnqd,bnkd->bnqk", q, k, precision=hi) * scale + mask_add
        attns.append(s)
        p = jax.nn.softmax(s, axis=-1)
        ctx = jnp.einsum("bnqk,bnkd->bnqd", p, v, precision=hi)
        attn_out = jnp.einsum("bnsd,ndh->bsh", ctx, params["wo"][l], precision=hi) + params["bo"][l]
        x = _layernorm(x + attn_out, params["attn_ln_g"][l], params["attn_ln_b"][l])
        h1 = _gelu(jnp.einsum("bsh,hf->bsf", x, params["w1"][l], precision=hi) + params["b1"][l])
        y = jnp.einsum("bsf,fh->bsh", h1, params["w2"][l], precision=hi) + params["b2"][l]
        x = _layernorm(x + y, params["ffn_ln_g"][l], params["ffn_ln_b"][l])
        fits.append(jnp.einsum("bsh,hf->bsf", x, params["fit_w"][l + 1], precision=hi)
                    + params["fit_b"][l + 1])
    return x, attns, fits


# ---------------------------------- main -------------------------------------
if __name__ == "__main__":
    cfg = dict(vocab_size=30, max_position=16, num_segments=2,
               hidden_size=32, num_layers=2, num_heads=2, head_dim=16,
               ffn_size=64, fit_size=48)
    assert cfg["num_heads"] * cfg["head_dim"] == cfg["hidden_size"]

    key = jax.random.PRNGKey(0)
    pkey, dkey = jax.random.split(key)
    params = init_params(pkey, cfg)

    B, S = 2, 8
    token_ids = jax.random.randint(dkey, (B, S), 0, cfg["vocab_size"], dtype=jnp.int32)
    segment_ids = jnp.zeros((B, S), jnp.int32)
    position_ids = jnp.broadcast_to(jnp.arange(S, dtype=jnp.int32), (B, S))
    attn_mask = jnp.ones((B, 1, S), jnp.float32).at[1, 0, S - 1].set(0.0)

    fwd = jax.jit(functools.partial(tiny_bert_forward, cfg=cfg))
    output, all_attn, all_ffn = fwd(params, token_ids, segment_ids, position_ids, attn_mask)
    jax.block_until_ready((output, all_attn, all_ffn))

    # shape checks
    assert output.shape == (B, S, cfg["hidden_size"])
    assert len(all_attn) == cfg["num_layers"]
    assert len(all_ffn) == cfg["num_layers"] + 1
    assert all(a.shape == (B, cfg["num_heads"], S, S) for a in all_attn)
    assert all(f.shape == (B, S, cfg["fit_size"]) for f in all_ffn)

    # numeric check against a plain-JAX reference of the same math
    ref_out, ref_attn, ref_ffn = reference_forward(
        params, token_ids, segment_ids, position_ids, attn_mask, cfg)

    def _close(a, b):
        return float(jnp.max(jnp.abs(a - b))) < 2e-3

    assert _close(output, ref_out), "final hidden states mismatch"
    assert all(_close(a, r) for a, r in zip(all_attn, ref_attn)), "attention scores mismatch"
    assert all(_close(f, r) for f, r in zip(all_ffn, ref_ffn)), "fit outputs mismatch"

    print("KERNEL_OK")
</pallas_src>

<mosaic_0001>
module attributes {stable_mosaic.version = 11 : i64} {
  func.func @fused_bert_kernel(%arg0: i32, %arg1: memref<1x8x32xf32, #tpu.memory_space<vmem>>, %arg2: memref<1x1x8xf32, #tpu.memory_space<vmem>>, %arg3: memref<1x32xf32, #tpu.memory_space<vmem>>, %arg4: memref<1x32xf32, #tpu.memory_space<vmem>>, %arg5: memref<2x2x32x16xf32, #tpu.memory_space<vmem>>, %arg6: memref<2x2x1x16xf32, #tpu.memory_space<vmem>>, %arg7: memref<2x2x32x16xf32, #tpu.memory_space<vmem>>, %arg8: memref<2x2x1x16xf32, #tpu.memory_space<vmem>>, %arg9: memref<2x2x32x16xf32, #tpu.memory_space<vmem>>, %arg10: memref<2x2x1x16xf32, #tpu.memory_space<vmem>>, %arg11: memref<2x2x16x32xf32, #tpu.memory_space<vmem>>, %arg12: memref<2x1x32xf32, #tpu.memory_space<vmem>>, %arg13: memref<2x1x32xf32, #tpu.memory_space<vmem>>, %arg14: memref<2x1x32xf32, #tpu.memory_space<vmem>>, %arg15: memref<2x32x64xf32, #tpu.memory_space<vmem>>, %arg16: memref<2x1x64xf32, #tpu.memory_space<vmem>>, %arg17: memref<2x64x32xf32, #tpu.memory_space<vmem>>, %arg18: memref<2x1x32xf32, #tpu.memory_space<vmem>>, %arg19: memref<2x1x32xf32, #tpu.memory_space<vmem>>, %arg20: memref<2x1x32xf32, #tpu.memory_space<vmem>>, %arg21: memref<3x32x48xf32, #tpu.memory_space<vmem>>, %arg22: memref<3x1x48xf32, #tpu.memory_space<vmem>>, %arg23: memref<1x8x32xf32, #tpu.memory_space<vmem>>, %arg24: memref<1x4x8x8xf32, #tpu.memory_space<vmem>>, %arg25: memref<1x3x8x48xf32, #tpu.memory_space<vmem>>) attributes {dimension_semantics = [#tpu.dimension_semantics<parallel>], iteration_bounds = array<i64: 2>, scalar_prefetch = 0 : i64, scratch_operands = 0 : i64, tpu.core_type = #tpu.core_type<tc>, window_params = [{transform_indices = @transform_0, window_bounds = array<i64: 1, 8, 32>}, {transform_indices = @transform_1, window_bounds = array<i64: 1, 1, 8>}, {pipeline_mode = #tpu.pipeline_mode<synchronous>, transform_indices = @transform_2, window_bounds = array<i64: 1, 32>}, {pipeline_mode = #tpu.pipeline_mode<synchronous>, transform_indices = @transform_3, window_bounds = array<i64: 1, 32>}, {pipeline_mode = #tpu.pipeline_mode<synchronous>, transform_indices = @transform_4, window_bounds = array<i64: 2, 2, 32, 16>}, {pipeline_mode = #tpu.pipeline_mode<synchronous>, transform_indices = @transform_5, window_bounds = array<i64: 2, 2, 1, 16>}, {pipeline_mode = #tpu.pipeline_mode<synchronous>, transform_indices = @transform_6, window_bounds = array<i64: 2, 2, 32, 16>}, {pipeline_mode = #tpu.pipeline_mode<synchronous>, transform_indices = @transform_7, window_bounds = array<i64: 2, 2, 1, 16>}, {pipeline_mode = #tpu.pipeline_mode<synchronous>, transform_indices = @transform_8, window_bounds = array<i64: 2, 2, 32, 16>}, {pipeline_mode = #tpu.pipeline_mode<synchronous>, transform_indices = @transform_9, window_bounds = array<i64: 2, 2, 1, 16>}, {pipeline_mode = #tpu.pipeline_mode<synchronous>, transform_indices = @transform_10, window_bounds = array<i64: 2, 2, 16, 32>}, {pipeline_mode = #tpu.pipeline_mode<synchronous>, transform_indices = @transform_11, window_bounds = array<i64: 2, 1, 32>}, {pipeline_mode = #tpu.pipeline_mode<synchronous>, transform_indices = @transform_12, window_bounds = array<i64: 2, 1, 32>}, {pipeline_mode = #tpu.pipeline_mode<synchronous>, transform_indices = @transform_13, window_bounds = array<i64: 2, 1, 32>}, {pipeline_mode = #tpu.pipeline_mode<synchronous>, transform_indices = @transform_14, window_bounds = array<i64: 2, 32, 64>}, {pipeline_mode = #tpu.pipeline_mode<synchronous>, transform_indices = @transform_15, window_bounds = array<i64: 2, 1, 64>}, {pipeline_mode = #tpu.pipeline_mode<synchronous>, transform_indices = @transform_16, window_bounds = array<i64: 2, 64, 32>}, {pipeline_mode = #tpu.pipeline_mode<synchronous>, transform_indices = @transform_17, window_bounds = array<i64: 2, 1, 32>}, {pipeline_mode = #tpu.pipeline_mode<synchronous>, transform_indices = @transform_18, window_bounds = array<i64: 2, 1, 32>}, {pipeline_mode = #tpu.pipeline_mode<synchronous>, transform_indices = @transform_19, window_bounds = array<i64: 2, 1, 32>}, {pipeline_mode = #tpu.pipeline_mode<synchronous>, transform_indices = @transform_20, window_bounds = array<i64: 3, 32, 48>}, {pipeline_mode = #tpu.pipeline_mode<synchronous>, transform_indices = @transform_21, window_bounds = array<i64: 3, 1, 48>}, {transform_indices = @transform_22, window_bounds = array<i64: 1, 8, 32>}, {transform_indices = @transform_23, window_bounds = array<i64: 1, 4, 8, 8>}, {transform_indices = @transform_24, window_bounds = array<i64: 1, 3, 8, 48>}]} {
    %c0 = arith.constant 0 : index
    %c0_0 = arith.constant 0 : index
    %c0_1 = arith.constant 0 : index
    %0 = vector.load %arg1[%c0, %c0_0, %c0_1] : memref<1x8x32xf32, #tpu.memory_space<vmem>>, vector<1x8x32xf32>
    %1 = vector.shape_cast %0 : vector<1x8x32xf32> to vector<8x32xf32>
    %c0_2 = arith.constant 0 : index
    %c0_3 = arith.constant 0 : index
    %2 = vector.load %arg3[%c0_2, %c0_3] : memref<1x32xf32, #tpu.memory_space<vmem>>, vector<1x32xf32>
    %c0_4 = arith.constant 0 : index
    %c0_5 = arith.constant 0 : index
    %3 = vector.load %arg4[%c0_4, %c0_5] : memref<1x32xf32, #tpu.memory_space<vmem>>, vector<1x32xf32>
    %cst = arith.constant dense<0.000000e+00> : vector<8xf32>
    %4 = vector.multi_reduction <add>, %1, %cst [1] : vector<8x32xf32> to vector<8xf32>
    %5 = vector.shape_cast %4 : vector<8xf32> to vector<8x1xf32>
    %cst_6 = arith.constant 3.200000e+01 : f32
    %6 = vector.broadcast %cst_6 : f32 to vector<8x1xf32>
    %7 = arith.divf %5, %6 : vector<8x1xf32>
    %8 = vector.broadcast %7 : vector<8x1xf32> to vector<8x32xf32>
    %9 = arith.subf %1, %8 : vector<8x32xf32>
    %10 = arith.mulf %9, %9 : vector<8x32xf32>
    %cst_7 = arith.constant dense<0.000000e+00> : vector<8xf32>
    %11 = vector.multi_reduction <add>, %10, %cst_7 [1] : vector<8x32xf32> to vector<8xf32>
    %12 = vector.shape_cast %11 : vector<8xf32> to vector<8x1xf32>
    %cst_8 = arith.constant 3.200000e+01 : f32
    %13 = vector.broadcast %cst_8 : f32 to vector<8x1xf32>
    %14 = arith.divf %12, %13 : vector<8x1xf32>
    %15 = vector.broadcast %7 : vector<8x1xf32> to vector<8x32xf32>
    %16 = arith.subf %1, %15 : vector<8x32xf32>
    %cst_9 = arith.constant 9.99999996E-13 : f32
    %17 = vector.broadcast %cst_9 : f32 to vector<8x1xf32>
    %18 = arith.addf %14, %17 : vector<8x1xf32>
    %19 = math.rsqrt %18 : vector<8x1xf32>
    %20 = vector.broadcast %19 : vector<8x1xf32> to vector<8x32xf32>
    %21 = arith.mulf %16, %20 : vector<8x32xf32>
    %22 = vector.broadcast %2 : vector<1x32xf32> to vector<8x32xf32>
    %23 = arith.mulf %21, %22 : vector<8x32xf32>
    %24 = vector.broadcast %3 : vector<1x32xf32> to vector<8x32xf32>
    %25 = arith.addf %23, %24 : vector<8x32xf32>
    %c0_10 = arith.constant 0 : index
    %c0_11 = arith.constant 0 : index
    %c0_12 = arith.constant 0 : index
    %26 = vector.load %arg2[%c0_10, %c0_11, %c0_12] : memref<1x1x8xf32, #tpu.memory_space<vmem>>, vector<1x1x8xf32>
    %27 = vector.shape_cast %26 : vector<1x1x8xf32> to vector<1x8xf32>
    %cst_13 = arith.constant 1.000000e+00 : f32
    %28 = vector.broadcast %cst_13 : f32 to vector<1x8xf32>
    %29 = arith.subf %28, %27 : vector<1x8xf32>
    %cst_14 = arith.constant -1.000000e+04 : f32
    %30 = vector.broadcast %cst_14 : f32 to vector<1x8xf32>
    %31 = arith.mulf %29, %30 : vector<1x8xf32>
    %c0_15 = arith.constant 0 : index
    %c0_16 = arith.constant 0 : index
    %c0_17 = arith.constant 0 : index
    %32 = vector.load %arg21[%c0_15, %c0_16, %c0_17] : memref<3x32x48xf32, #tpu.memory_space<vmem>>, vector<1x32x48xf32>
    %33 = vector.shape_cast %32 : vector<1x32x48xf32> to vector<32x48xf32>
    %cst_18 = arith.constant dense<0.000000e+00> : vector<8x48xf32>
    %34 = tpu.matmul %25, %33, %cst_18 {dimension_numbers = #tpu.dot_dimension_numbers<[1], [0], [0], [1], [0, 0, 1, 1], [], []>} : vector<8x32xf32>, vector<32x48xf32>, vector<8x48xf32> -> vector<8x48xf32>
    %c0_19 = arith.constant 0 : index
    %c0_20 = arith.constant 0 : index
    %c0_21 = arith.constant 0 : index
    %35 = vector.load %arg22[%c0_19, %c0_20, %c0_21] : memref<3x1x48xf32, #tpu.memory_space<vmem>>, vector<1x1x48xf32>
    %36 = vector.shape_cast %35 : vector<1x1x48xf32> to vector<1x48xf32>
    %37 = vector.broadcast %36 : vector<1x48xf32> to vector<8x48xf32>
    %38 = arith.addf %34, %37 : vector<8x48xf32>
    %c0_22 = arith.constant 0 : index
    %c0_23 = arith.constant 0 : index
    %c0_24 = arith.constant 0 : index
    %c0_25 = arith.constant 0 : index
    %39 = vector.load %arg25[%c0_22, %c0_23, %c0_24, %c0_25] : memref<1x3x8x48xf32, #tpu.memory_space<vmem>>, vector<1x1x8x48xf32>
    %40 = vector.shape_cast %39 : vector<1x1x8x48xf32> to vector<8x48xf32>
    %41 = vector.shape_cast %38 : vector<8x48xf32> to vector<1x1x8x48xf32>
    tpu.vector_store %arg25[%c0_22, %c0_23, %c0_24, %c0_25], %41 {strides = array<i32>} : memref<1x3x8x48xf32, #tpu.memory_space<vmem>>, vector<1x1x8x48xf32>,
    %c0_26 = arith.constant 0 : index
    %c0_27 = arith.constant 0 : index
    %c0_28 = arith.constant 0 : index
    %c0_29 = arith.constant 0 : index
    %42 = vector.load %arg5[%c0_26, %c0_27, %c0_28, %c0_29] : memref<2x2x32x16xf32, #tpu.memory_space<vmem>>, vector<1x1x32x16xf32>
    %43 = vector.shape_cast %42 : vector<1x1x32x16xf32> to vector<32x16xf32>
    %cst_30 = arith.constant dense<0.000000e+00> : vector<8x16xf32>
    %44 = tpu.matmul %25, %43, %cst_30 {dimension_numbers = #tpu.dot_dimension_numbers<[1], [0], [0], [1], [0, 0, 1, 1], [], []>} : vector<8x32xf32>, vector<32x16xf32>, vector<8x16xf32> -> vector<8x16xf32>
    %c0_31 = arith.constant 0 : index
    %c0_32 = arith.constant 0 : index
    %c0_33 = arith.constant 0 : index
    %c0_34 = arith.constant 0 : index
    %45 = vector.load %arg6[%c0_31, %c0_32, %c0_33, %c0_34] : memref<2x2x1x16xf32, #tpu.memory_space<vmem>>, vector<1x1x1x16xf32>
    %46 = vector.shape_cast %45 : vector<1x1x1x16xf32> to vector<1x16xf32>
    %47 = vector.broadcast %46 : vector<1x16xf32> to vector<8x16xf32>
    %48 = arith.addf %44, %47 : vector<8x16xf32>
    %c0_35 = arith.constant 0 : index
    %c0_36 = arith.constant 0 : index
    %c0_37 = arith.constant 0 : index
    %c0_38 = arith.constant 0 : index
    %49 = vector.load %arg7[%c0_35, %c0_36, %c0_37, %c0_38] : memref<2x2x32x16xf32, #tpu.memory_space<vmem>>, vector<1x1x32x16xf32>
    %50 = vector.shape_cast %49 : vector<1x1x32x16xf32> to vector<32x16xf32>
    %cst_39 = arith.constant dense<0.000000e+00> : vector<8x16xf32>
    %51 = tpu.matmul %25, %50, %cst_39 {dimension_numbers = #tpu.dot_dimension_numbers<[1], [0], [0], [1], [0, 0, 1, 1], [], []>} : vector<8x32xf32>, vector<32x16xf32>, vector<8x16xf32> -> vector<8x16xf32>
    %c0_40 = arith.constant 0 : index
    %c0_41 = arith.constant 0 : index
    %c0_42 = arith.constant 0 : index
    %c0_43 = arith.constant 0 : index
    %52 = vector.load %arg8[%c0_40, %c0_41, %c0_42, %c0_43] : memref<2x2x1x16xf32, #tpu.memory_space<vmem>>, vector<1x1x1x16xf32>
    %53 = vector.shape_cast %52 : vector<1x1x1x16xf32> to vector<1x16xf32>
    %54 = vector.broadcast %53 : vector<1x16xf32> to vector<8x16xf32>
    %55 = arith.addf %51, %54 : vector<8x16xf32>
    %c0_44 = arith.constant 0 : index
    %c0_45 = arith.constant 0 : index
    %c0_46 = arith.constant 0 : index
    %c0_47 = arith.constant 0 : index
    %56 = vector.load %arg9[%c0_44, %c0_45, %c0_46, %c0_47] : memref<2x2x32x16xf32, #tpu.memory_space<vmem>>, vector<1x1x32x16xf32>
    %57 = vector.shape_cast %56 : vector<1x1x32x16xf32> to vector<32x16xf32>
    %cst_48 = arith.constant dense<0.000000e+00> : vector<8x16xf32>
    %58 = tpu.matmul %25, %57, %cst_48 {dimension_numbers = #tpu.dot_dimension_numbers<[1], [0], [0], [1], [0, 0, 1, 1], [], []>} : vector<8x32xf32>, vector<32x16xf32>, vector<8x16xf32> -> vector<8x16xf32>
    %c0_49 = arith.constant 0 : index
    %c0_50 = arith.constant 0 : index
    %c0_51 = arith.constant 0 : index
    %c0_52 = arith.constant 0 : index
    %59 = vector.load %arg10[%c0_49, %c0_50, %c0_51, %c0_52] : memref<2x2x1x16xf32, #tpu.memory_space<vmem>>, vector<1x1x1x16xf32>
    %60 = vector.shape_cast %59 : vector<1x1x1x16xf32> to vector<1x16xf32>
    %61 = vector.broadcast %60 : vector<1x16xf32> to vector<8x16xf32>
    %62 = arith.addf %58, %61 : vector<8x16xf32>
    %cst_53 = arith.constant dense<0.000000e+00> : vector<8x8xf32>
    %63 = tpu.matmul %48, %55, %cst_53 {dimension_numbers = #tpu.dot_dimension_numbers<[1], [1], [0], [0], [0, 0, 1, 0], [], []>} : vector<8x16xf32>, vector<8x16xf32>, vector<8x8xf32> -> vector<8x8xf32>
    %cst_54 = arith.constant 2.500000e-01 : f32
    %64 = vector.broadcast %cst_54 : f32 to vector<8x8xf32>
    %65 = arith.mulf %63, %64 : vector<8x8xf32>
    %66 = vector.broadcast %31 : vector<1x8xf32> to vector<8x8xf32>
    %67 = arith.addf %65, %66 : vector<8x8xf32>
    %c0_55 = arith.constant 0 : index
    %c0_56 = arith.constant 0 : index
    %c0_57 = arith.constant 0 : index
    %c0_58 = arith.constant 0 : index
    %68 = vector.load %arg24[%c0_55, %c0_56, %c0_57, %c0_58] : memref<1x4x8x8xf32, #tpu.memory_space<vmem>>, vector<1x1x8x8xf32>
    %69 = vector.shape_cast %68 : vector<1x1x8x8xf32> to vector<8x8xf32>
    %70 = vector.shape_cast %67 : vector<8x8xf32> to vector<1x1x8x8xf32>
    tpu.vector_store %arg24[%c0_55, %c0_56, %c0_57, %c0_58], %70 {strides = array<i32>} : memref<1x4x8x8xf32, #tpu.memory_space<vmem>>, vector<1x1x8x8xf32>,
    %cst_59 = arith.constant dense<0xFF800000> : vector<8xf32>
    %71 = vector.multi_reduction <maximumf>, %67, %cst_59 [1] : vector<8x8xf32> to vector<8xf32>
    %cst_60 = arith.constant 0xFF800000 : f32
    %72 = vector.broadcast %cst_60 : f32 to vector<8xf32>
    %73 = arith.maximumf %72, %71 : vector<8xf32>
    %74 = vector.shape_cast %73 : vector<8xf32> to vector<8x1xf32>
    %75 = vector.broadcast %74 : vector<8x1xf32> to vector<8x8xf32>
    %76 = arith.subf %67, %75 : vector<8x8xf32>
    %77 = math.exp %76 : vector<8x8xf32>
    %cst_61 = arith.constant dense<0.000000e+00> : vector<8xf32>
    %78 = vector.multi_reduction <add>, %77, %cst_61 [1] : vector<8x8xf32> to vector<8xf32>
    %79 = vector.shape_cast %78 : vector<8xf32> to vector<8x1xf32>
    %80 = vector.broadcast %79 : vector<8x1xf32> to vector<8x8xf32>
    %81 = arith.divf %77, %80 : vector<8x8xf32>
    %cst_62 = arith.constant dense<0.000000e+00> : vector<8x16xf32>
    %82 = tpu.matmul %81, %62, %cst_62 {dimension_numbers = #tpu.dot_dimension_numbers<[1], [0], [0], [1], [0, 0, 1, 1], [], []>} : vector<8x8xf32>, vector<8x16xf32>, vector<8x16xf32> -> vector<8x16xf32>
    %c0_63 = arith.constant 0 : index
    %c0_64 = arith.constant 0 : index
    %c0_65 = arith.constant 0 : index
    %c0_66 = arith.constant 0 : index
    %83 = vector.load %arg11[%c0_63, %c0_64, %c0_65, %c0_66] : memref<2x2x16x32xf32, #tpu.memory_space<vmem>>, vector<1x1x16x32xf32>
    %84 = vector.shape_cast %83 : vector<1x1x16x32xf32> to vector<16x32xf32>
    %cst_67 = arith.constant dense<0.000000e+00> : vector<8x32xf32>
    %85 = tpu.matmul %82, %84, %cst_67 {dimension_numbers = #tpu.dot_dimension_numbers<[1], [0], [0], [1], [0, 0, 1, 1], [], []>} : vector<8x16xf32>, vector<16x32xf32>, vector<8x32xf32> -> vector<8x32xf32>
    %c0_68 = arith.constant 0 : index
    %c1 = arith.constant 1 : index
    %c0_69 = arith.constant 0 : index
    %c0_70 = arith.constant 0 : index
    %86 = vector.load %arg5[%c0_68, %c1, %c0_69, %c0_70] : memref<2x2x32x16xf32, #tpu.memory_space<vmem>>, vector<1x1x32x16xf32>
    %87 = vector.shape_cast %86 : vector<1x1x32x16xf32> to vector<32x16xf32>
    %cst_71 = arith.constant dense<0.000000e+00> : vector<8x16xf32>
    %88 = tpu.matmul %25, %87, %cst_71 {dimension_numbers = #tpu.dot_dimension_numbers<[1], [0], [0], [1], [0, 0, 1, 1], [], []>} : vector<8x32xf32>, vector<32x16xf32>, vector<8x16xf32> -> vector<8x16xf32>
    %c0_72 = arith.constant 0 : index
    %c1_73 = arith.constant 1 : index
    %c0_74 = arith.constant 0 : index
    %c0_75 = arith.constant 0 : index
    %89 = vector.load %arg6[%c0_72, %c1_73, %c0_74, %c0_75] : memref<2x2x1x16xf32, #tpu.memory_space<vmem>>, vector<1x1x1x16xf32>
    %90 = vector.shape_cast %89 : vector<1x1x1x16xf32> to vector<1x16xf32>
    %91 = vector.broadcast %90 : vector<1x16xf32> to vector<8x16xf32>
    %92 = arith.addf %88, %91 : vector<8x16xf32>
    %c0_76 = arith.constant 0 : index
    %c1_77 = arith.constant 1 : index
    %c0_78 = arith.constant 0 : index
    %c0_79 = arith.constant 0 : index
    %93 = vector.load %arg7[%c0_76, %c1_77, %c0_78, %c0_79] : memref<2x2x32x16xf32, #tpu.memory_space<vmem>>, vector<1x1x32x16xf32>
    %94 = vector.shape_cast %93 : vector<1x1x32x16xf32> to vector<32x16xf32>
    %cst_80 = arith.constant dense<0.000000e+00> : vector<8x16xf32>
    %95 = tpu.matmul %25, %94, %cst_80 {dimension_numbers = #tpu.dot_dimension_numbers<[1], [0], [0], [1], [0, 0, 1, 1], [], []>} : vector<8x32xf32>, vector<32x16xf32>, vector<8x16xf32> -> vector<8x16xf32>
    %c0_81 = arith.constant 0 : index
    %c1_82 = arith.constant 1 : index
    %c0_83 = arith.constant 0 : index
    %c0_84 = arith.constant 0 : index
    %96 = vector.load %arg8[%c0_81, %c1_82, %c0_83, %c0_84] : memref<2x2x1x16xf32, #tpu.memory_space<vmem>>, vector<1x1x1x16xf32>
    %97 = vector.shape_cast %96 : vector<1x1x1x16xf32> to vector<1x16xf32>
    %98 = vector.broadcast %97 : vector<1x16xf32> to vector<8x16xf32>
    %99 = arith.addf %95, %98 : vector<8x16xf32>
    %c0_85 = arith.constant 0 : index
    %c1_86 = arith.constant 1 : index
    %c0_87 = arith.constant 0 : index
    %c0_88 = arith.constant 0 : index
    %100 = vector.load %arg9[%c0_85, %c1_86, %c0_87, %c0_88] : memref<2x2x32x16xf32, #tpu.memory_space<vmem>>, vector<1x1x32x16xf32>
    %101 = vector.shape_cast %100 : vector<1x1x32x16xf32> to vector<32x16xf32>
    %cst_89 = arith.constant dense<0.000000e+00> : vector<8x16xf32>
    %102 = tpu.matmul %25, %101, %cst_89 {dimension_numbers = #tpu.dot_dimension_numbers<[1], [0], [0], [1], [0, 0, 1, 1], [], []>} : vector<8x32xf32>, vector<32x16xf32>, vector<8x16xf32> -> vector<8x16xf32>
    %c0_90 = arith.constant 0 : index
    %c1_91 = arith.constant 1 : index
    %c0_92 = arith.constant 0 : index
    %c0_93 = arith.constant 0 : index
    %103 = vector.load %arg10[%c0_90, %c1_91, %c0_92, %c0_93] : memref<2x2x1x16xf32, #tpu.memory_space<vmem>>, vector<1x1x1x16xf32>
    %104 = vector.shape_cast %103 : vector<1x1x1x16xf32> to vector<1x16xf32>
    %105 = vector.broadcast %104 : vector<1x16xf32> to vector<8x16xf32>
    %106 = arith.addf %102, %105 : vector<8x16xf32>
    %cst_94 = arith.constant dense<0.000000e+00> : vector<8x8xf32>
    %107 = tpu.matmul %92, %99, %cst_94 {dimension_numbers = #tpu.dot_dimension_numbers<[1], [1], [0], [0], [0, 0, 1, 0], [], []>} : vector<8x16xf32>, vector<8x16xf32>, vector<8x8xf32> -> vector<8x8xf32>
    %cst_95 = arith.constant 2.500000e-01 : f32
    %108 = vector.broadcast %cst_95 : f32 to vector<8x8xf32>
    %109 = arith.mulf %107, %108 : vector<8x8xf32>
    %110 = vector.broadcast %31 : vector<1x8xf32> to vector<8x8xf32>
    %111 = arith.addf %109, %110 : vector<8x8xf32>
    %c0_96 = arith.constant 0 : index
    %c1_97 = arith.constant 1 : index
    %c0_98 = arith.constant 0 : index
    %c0_99 = arith.constant 0 : index
    %112 = vector.load %arg24[%c0_96, %c1_97, %c0_98, %c0_99] : memref<1x4x8x8xf32, #tpu.memory_space<vmem>>, vector<1x1x8x8xf32>
    %113 = vector.shape_cast %112 : vector<1x1x8x8xf32> to vector<8x8xf32>
    %114 = vector.shape_cast %111 : vector<8x8xf32> to vector<1x1x8x8xf32>
    tpu.vector_store %arg24[%c0_96, %c1_97, %c0_98, %c0_99], %114 {strides = array<i32>} : memref<1x4x8x8xf32, #tpu.memory_space<vmem>>, vector<1x1x8x8xf32>,
    %cst_100 = arith.constant dense<0xFF800000> : vector<8xf32>
    %115 = vector.multi_reduction <maximumf>, %111, %cst_100 [1] : vector<8x8xf32> to vector<8xf32>
    %cst_101 = arith.constant 0xFF800000 : f32
    %116 = vector.broadcast %cst_101 : f32 to vector<8xf32>
    %117 = arith.maximumf %116, %115 : vector<8xf32>
    %118 = vector.shape_cast %117 : vector<8xf32> to vector<8x1xf32>
    %119 = vector.broadcast %118 : vector<8x1xf32> to vector<8x8xf32>
    %120 = arith.subf %111, %119 : vector<8x8xf32>
    %121 = math.exp %120 : vector<8x8xf32>
    %cst_102 = arith.constant dense<0.000000e+00> : vector<8xf32>
    %122 = vector.multi_reduction <add>, %121, %cst_102 [1] : vector<8x8xf32> to vector<8xf32>
    %123 = vector.shape_cast %122 : vector<8xf32> to vector<8x1xf32>
    %124 = vector.broadcast %123 : vector<8x1xf32> to vector<8x8xf32>
    %125 = arith.divf %121, %124 : vector<8x8xf32>
    %cst_103 = arith.constant dense<0.000000e+00> : vector<8x16xf32>
    %126 = tpu.matmul %125, %106, %cst_103 {dimension_numbers = #tpu.dot_dimension_numbers<[1], [0], [0], [1], [0, 0, 1, 1], [], []>} : vector<8x8xf32>, vector<8x16xf32>, vector<8x16xf32> -> vector<8x16xf32>
    %c0_104 = arith.constant 0 : index
    %c1_105 = arith.constant 1 : index
    %c0_106 = arith.constant 0 : index
    %c0_107 = arith.constant 0 : index
    %127 = vector.load %arg11[%c0_104, %c1_105, %c0_106, %c0_107] : memref<2x2x16x32xf32, #tpu.memory_space<vmem>>, vector<1x1x16x32xf32>
    %128 = vector.shape_cast %127 : vector<1x1x16x32xf32> to vector<16x32xf32>
    %cst_108 = arith.constant dense<0.000000e+00> : vector<8x32xf32>
    %129 = tpu.matmul %126, %128, %cst_108 {dimension_numbers = #tpu.dot_dimension_numbers<[1], [0], [0], [1], [0, 0, 1, 1], [], []>} : vector<8x16xf32>, vector<16x32xf32>, vector<8x32xf32> -> vector<8x32xf32>
    %130 = arith.addf %85, %129 : vector<8x32xf32>
    %c0_109 = arith.constant 0 : index
    %c0_110 = arith.constant 0 : index
    %c0_111 = arith.constant 0 : index
    %131 = vector.load %arg12[%c0_109, %c0_110, %c0_111] : memref<2x1x32xf32, #tpu.memory_space<vmem>>, vector<1x1x32xf32>
    %132 = vector.shape_cast %131 : vector<1x1x32xf32> to vector<1x32xf32>
    %133 = vector.broadcast %132 : vector<1x32xf32> to vector<8x32xf32>
    %134 = arith.addf %130, %133 : vector<8x32xf32>
    %135 = arith.addf %25, %134 : vector<8x32xf32>
    %c0_112 = arith.constant 0 : index
    %c0_113 = arith.constant 0 : index
    %c0_114 = arith.constant 0 : index
    %136 = vector.load %arg13[%c0_112, %c0_113, %c0_114] : memref<2x1x32xf32, #tpu.memory_space<vmem>>, vector<1x1x32xf32>
    %137 = vector.shape_cast %136 : vector<1x1x32xf32> to vector<1x32xf32>
    %c0_115 = arith.constant 0 : index
    %c0_116 = arith.constant 0 : index
    %c0_117 = arith.constant 0 : index
    %138 = vector.load %arg14[%c0_115, %c0_116, %c0_117] : memref<2x1x32xf32, #tpu.memory_space<vmem>>, vector<1x1x32xf32>
    %139 = vector.shape_cast %138 : vector<1x1x32xf32> to vector<1x32xf32>
    %cst_118 = arith.constant dense<0.000000e+00> : vector<8xf32>
    %140 = vector.multi_reduction <add>, %135, %cst_118 [1] : vector<8x32xf32> to vector<8xf32>
    %141 = vector.shape_cast %140 : vector<8xf32> to vector<8x1xf32>
    %cst_119 = arith.constant 3.200000e+01 : f32
    %142 = vector.broadcast %cst_119 : f32 to vector<8x1xf32>
    %143 = arith.divf %141, %142 : vector<8x1xf32>
    %144 = vector.broadcast %143 : vector<8x1xf32> to vector<8x32xf32>
    %145 = arith.subf %135, %144 : vector<8x32xf32>
    %146 = arith.mulf %145, %145 : vector<8x32xf32>
    %cst_120 = arith.constant dense<0.000000e+00> : vector<8xf32>
    %147 = vector.multi_reduction <add>, %146, %cst_120 [1] : vector<8x32xf32> to vector<8xf32>
    %148 = vector.shape_cast %147 : vector<8xf32> to vector<8x1xf32>
    %cst_121 = arith.constant 3.200000e+01 : f32
    %149 = vector.broadcast %cst_121 : f32 to vector<8x1xf32>
    %150 = arith.divf %148, %149 : vector<8x1xf32>
    %151 = vector.broadcast %143 : vector<8x1xf32> to vector<8x32xf32>
    %152 = arith.subf %135, %151 : vector<8x32xf32>
    %cst_122 = arith.constant 9.99999996E-13 : f32
    %153 = vector.broadcast %cst_122 : f32 to vector<8x1xf32>
    %154 = arith.addf %150, %153 : vector<8x1xf32>
    %155 = math.rsqrt %154 : vector<8x1xf32>
    %156 = vector.broadcast %155 : vector<8x1xf32> to vector<8x32xf32>
    %157 = arith.mulf %152, %156 : vector<8x32xf32>
    %158 = vector.broadcast %137 : vector<1x32xf32> to vector<8x32xf32>
    %159 = arith.mulf %157, %158 : vector<8x32xf32>
    %160 = vector.broadcast %139 : vector<1x32xf32> to vector<8x32xf32>
    %161 = arith.addf %159, %160 : vector<8x32xf32>
    %c0_123 = arith.constant 0 : index
    %c0_124 = arith.constant 0 : index
    %c0_125 = arith.constant 0 : index
    %162 = vector.load %arg15[%c0_123, %c0_124, %c0_125] : memref<2x32x64xf32, #tpu.memory_space<vmem>>, vector<1x32x64xf32>
    %163 = vector.shape_cast %162 : vector<1x32x64xf32> to vector<32x64xf32>
    %cst_126 = arith.constant dense<0.000000e+00> : vector<8x64xf32>
    %164 = tpu.matmul %161, %163, %cst_126 {dimension_numbers = #tpu.dot_dimension_numbers<[1], [0], [0], [1], [0, 0, 1, 1], [], []>} : vector<8x32xf32>, vector<32x64xf32>, vector<8x64xf32> -> vector<8x64xf32>
    %c0_127 = arith.constant 0 : index
    %c0_128 = arith.constant 0 : index
    %c0_129 = arith.constant 0 : index
    %165 = vector.load %arg16[%c0_127, %c0_128, %c0_129] : memref<2x1x64xf32, #tpu.memory_space<vmem>>, vector<1x1x64xf32>
    %166 = vector.shape_cast %165 : vector<1x1x64xf32> to vector<1x64xf32>
    %167 = vector.broadcast %166 : vector<1x64xf32> to vector<8x64xf32>
    %168 = arith.addf %164, %167 : vector<8x64xf32>
    %cst_130 = arith.constant 5.000000e-01 : f32
    %169 = vector.broadcast %cst_130 : f32 to vector<8x64xf32>
    %170 = arith.mulf %169, %168 : vector<8x64xf32>
    %cst_131 = arith.constant 4.471500e-02 : f32
    %171 = vector.broadcast %cst_131 : f32 to vector<8x64xf32>
    %172 = arith.mulf %171, %168 : vector<8x64xf32>
    %173 = arith.mulf %172, %168 : vector<8x64xf32>
    %174 = arith.mulf %173, %168 : vector<8x64xf32>
    %175 = arith.addf %168, %174 : vector<8x64xf32>
    %cst_132 = arith.constant 0.797884583 : f32
    %176 = vector.broadcast %cst_132 : f32 to vector<8x64xf32>
    %177 = arith.mulf %176, %175 : vector<8x64xf32>
    %178 = math.tanh %177 : vector<8x64xf32>
    %cst_133 = arith.constant 1.000000e+00 : f32
    %179 = vector.broadcast %cst_133 : f32 to vector<8x64xf32>
    %180 = arith.addf %179, %178 : vector<8x64xf32>
    %181 = arith.mulf %170, %180 : vector<8x64xf32>
    %c0_134 = arith.constant 0 : index
    %c0_135 = arith.constant 0 : index
    %c0_136 = arith.constant 0 : index
    %182 = vector.load %arg17[%c0_134, %c0_135, %c0_136] : memref<2x64x32xf32, #tpu.memory_space<vmem>>, vector<1x64x32xf32>
    %183 = vector.shape_cast %182 : vector<1x64x32xf32> to vector<64x32xf32>
    %cst_137 = arith.constant dense<0.000000e+00> : vector<8x32xf32>
    %184 = tpu.matmul %181, %183, %cst_137 {dimension_numbers = #tpu.dot_dimension_numbers<[1], [0], [0], [1], [0, 0, 1, 1], [], []>} : vector<8x64xf32>, vector<64x32xf32>, vector<8x32xf32> -> vector<8x32xf32>
    %c0_138 = arith.constant 0 : index
    %c0_139 = arith.constant 0 : index
    %c0_140 = arith.constant 0 : index
    %185 = vector.load %arg18[%c0_138, %c0_139, %c0_140] : memref<2x1x32xf32, #tpu.memory_space<vmem>>, vector<1x1x32xf32>
    %186 = vector.shape_cast %185 : vector<1x1x32xf32> to vector<1x32xf32>
    %187 = vector.broadcast %186 : vector<1x32xf32> to vector<8x32xf32>
    %188 = arith.addf %184, %187 : vector<8x32xf32>
    %189 = arith.addf %161, %188 : vector<8x32xf32>
    %c0_141 = arith.constant 0 : index
    %c0_142 = arith.constant 0 : index
    %c0_143 = arith.constant 0 : index
    %190 = vector.load %arg19[%c0_141, %c0_142, %c0_143] : memref<2x1x32xf32, #tpu.memory_space<vmem>>, vector<1x1x32xf32>
    %191 = vector.shape_cast %190 : vector<1x1x32xf32> to vector<1x32xf32>
    %c0_144 = arith.constant 0 : index
    %c0_145 = arith.constant 0 : index
    %c0_146 = arith.constant 0 : index
    %192 = vector.load %arg20[%c0_144, %c0_145, %c0_146] : memref<2x1x32xf32, #tpu.memory_space<vmem>>, vector<1x1x32xf32>
    %193 = vector.shape_cast %192 : vector<1x1x32xf32> to vector<1x32xf32>
    %cst_147 = arith.constant dense<0.000000e+00> : vector<8xf32>
    %194 = vector.multi_reduction <add>, %189, %cst_147 [1] : vector<8x32xf32> to vector<8xf32>
    %195 = vector.shape_cast %194 : vector<8xf32> to vector<8x1xf32>
    %cst_148 = arith.constant 3.200000e+01 : f32
    %196 = vector.broadcast %cst_148 : f32 to vector<8x1xf32>
    %197 = arith.divf %195, %196 : vector<8x1xf32>
    %198 = vector.broadcast %197 : vector<8x1xf32> to vector<8x32xf32>
    %199 = arith.subf %189, %198 : vector<8x32xf32>
    %200 = arith.mulf %199, %199 : vector<8x32xf32>
    %cst_149 = arith.constant dense<0.000000e+00> : vector<8xf32>
    %201 = vector.multi_reduction <add>, %200, %cst_149 [1] : vector<8x32xf32> to vector<8xf32>
    %202 = vector.shape_cast %201 : vector<8xf32> to vector<8x1xf32>
    %cst_150 = arith.constant 3.200000e+01 : f32
    %203 = vector.broadcast %cst_150 : f32 to vector<8x1xf32>
    %204 = arith.divf %202, %203 : vector<8x1xf32>
    %205 = vector.broadcast %197 : vector<8x1xf32> to vector<8x32xf32>
    %206 = arith.subf %189, %205 : vector<8x32xf32>
    %cst_151 = arith.constant 9.99999996E-13 : f32
    %207 = vector.broadcast %cst_151 : f32 to vector<8x1xf32>
    %208 = arith.addf %204, %207 : vector<8x1xf32>
    %209 = math.rsqrt %208 : vector<8x1xf32>
    %210 = vector.broadcast %209 : vector<8x1xf32> to vector<8x32xf32>
    %211 = arith.mulf %206, %210 : vector<8x32xf32>
    %212 = vector.broadcast %191 : vector<1x32xf32> to vector<8x32xf32>
    %213 = arith.mulf %211, %212 : vector<8x32xf32>
    %214 = vector.broadcast %193 : vector<1x32xf32> to vector<8x32xf32>
    %215 = arith.addf %213, %214 : vector<8x32xf32>
    %c1_152 = arith.constant 1 : index
    %c0_153 = arith.constant 0 : index
    %c0_154 = arith.constant 0 : index
    %216 = vector.load %arg21[%c1_152, %c0_153, %c0_154] : memref<3x32x48xf32, #tpu.memory_space<vmem>>, vector<1x32x48xf32>
    %217 = vector.shape_cast %216 : vector<1x32x48xf32> to vector<32x48xf32>
    %cst_155 = arith.constant dense<0.000000e+00> : vector<8x48xf32>
    %218 = tpu.matmul %215, %217, %cst_155 {dimension_numbers = #tpu.dot_dimension_numbers<[1], [0], [0], [1], [0, 0, 1, 1], [], []>} : vector<8x32xf32>, vector<32x48xf32>, vector<8x48xf32> -> vector<8x48xf32>
    %c1_156 = arith.constant 1 : index
    %c0_157 = arith.constant 0 : index
    %c0_158 = arith.constant 0 : index
    %219 = vector.load %arg22[%c1_156, %c0_157, %c0_158] : memref<3x1x48xf32, #tpu.memory_space<vmem>>, vector<1x1x48xf32>
    %220 = vector.shape_cast %219 : vector<1x1x48xf32> to vector<1x48xf32>
    %221 = vector.broadcast %220 : vector<1x48xf32> to vector<8x48xf32>
    %222 = arith.addf %218, %221 : vector<8x48xf32>
    %c0_159 = arith.constant 0 : index
    %c1_160 = arith.constant 1 : index
    %c0_161 = arith.constant 0 : index
    %c0_162 = arith.constant 0 : index
    %223 = vector.load %arg25[%c0_159, %c1_160, %c0_161, %c0_162] : memref<1x3x8x48xf32, #tpu.memory_space<vmem>>, vector<1x1x8x48xf32>
    %224 = vector.shape_cast %223 : vector<1x1x8x48xf32> to vector<8x48xf32>
    %225 = vector.shape_cast %222 : vector<8x48xf32> to vector<1x1x8x48xf32>
    tpu.vector_store %arg25[%c0_159, %c1_160, %c0_161, %c0_162], %225 {strides = array<i32>} : memref<1x3x8x48xf32, #tpu.memory_space<vmem>>, vector<1x1x8x48xf32>,
    %c1_163 = arith.constant 1 : index
    %c0_164 = arith.constant 0 : index
    %c0_165 = arith.constant 0 : index
    %c0_166 = arith.constant 0 : index
    %226 = vector.load %arg5[%c1_163, %c0_164, %c0_165, %c0_166] : memref<2x2x32x16xf32, #tpu.memory_space<vmem>>, vector<1x1x32x16xf32>
    %227 = vector.shape_cast %226 : vector<1x1x32x16xf32> to vector<32x16xf32>
    %cst_167 = arith.constant dense<0.000000e+00> : vector<8x16xf32>
    %228 = tpu.matmul %215, %227, %cst_167 {dimension_numbers = #tpu.dot_dimension_numbers<[1], [0], [0], [1], [0, 0, 1, 1], [], []>} : vector<8x32xf32>, vector<32x16xf32>, vector<8x16xf32> -> vector<8x16xf32>
    %c1_168 = arith.constant 1 : index
    %c0_169 = arith.constant 0 : index
    %c0_170 = arith.constant 0 : index
    %c0_171 = arith.constant 0 : index
    %229 = vector.load %arg6[%c1_168, %c0_169, %c0_170, %c0_171] : memref<2x2x1x16xf32, #tpu.memory_space<vmem>>, vector<1x1x1x16xf32>
    %230 = vector.shape_cast %229 : vector<1x1x1x16xf32> to vector<1x16xf32>
    %231 = vector.broadcast %230 : vector<1x16xf32> to vector<8x16xf32>
    %232 = arith.addf %228, %231 : vector<8x16xf32>
    %c1_172 = arith.constant 1 : index
    %c0_173 = arith.constant 0 : index
    %c0_174 = arith.constant 0 : index
    %c0_175 = arith.constant 0 : index
    %233 = vector.load %arg7[%c1_172, %c0_173, %c0_174, %c0_175] : memref<2x2x32x16xf32, #tpu.memory_space<vmem>>, vector<1x1x32x16xf32>
    %234 = vector.shape_cast %233 : vector<1x1x32x16xf32> to vector<32x16xf32>
    %cst_176 = arith.constant dense<0.000000e+00> : vector<8x16xf32>
    %235 = tpu.matmul %215, %234, %cst_176 {dimension_numbers = #tpu.dot_dimension_numbers<[1], [0], [0], [1], [0, 0, 1, 1], [], []>} : vector<8x32xf32>, vector<32x16xf32>, vector<8x16xf32> -> vector<8x16xf32>
    %c1_177 = arith.constant 1 : index
    %c0_178 = arith.constant 0 : index
    %c0_179 = arith.constant 0 : index
    %c0_180 = arith.constant 0 : index
    %236 = vector.load %arg8[%c1_177, %c0_178, %c0_179, %c0_180] : memref<2x2x1x16xf32, #tpu.memory_space<vmem>>, vector<1x1x1x16xf32>
    %237 = vector.shape_cast %236 : vector<1x1x1x16xf32> to vector<1x16xf32>
    %238 = vector.broadcast %237 : vector<1x16xf32> to vector<8x16xf32>
    %239 = arith.addf %235, %238 : vector<8x16xf32>
    %c1_181 = arith.constant 1 : index
    %c0_182 = arith.constant 0 : index
    %c0_183 = arith.constant 0 : index
    %c0_184 = arith.constant 0 : index
    %240 = vector.load %arg9[%c1_181, %c0_182, %c0_183, %c0_184] : memref<2x2x32x16xf32, #tpu.memory_space<vmem>>, vector<1x1x32x16xf32>
    %241 = vector.shape_cast %240 : vector<1x1x32x16xf32> to vector<32x16xf32>
    %cst_185 = arith.constant dense<0.000000e+00> : vector<8x16xf32>
    %242 = tpu.matmul %215, %241, %cst_185 {dimension_numbers = #tpu.dot_dimension_numbers<[1], [0], [0], [1], [0, 0, 1, 1], [], []>} : vector<8x32xf32>, vector<32x16xf32>, vector<8x16xf32> -> vector<8x16xf32>
    %c1_186 = arith.constant 1 : index
    %c0_187 = arith.constant 0 : index
    %c0_188 = arith.constant 0 : index
    %c0_189 = arith.constant 0 : index
    %243 = vector.load %arg10[%c1_186, %c0_187, %c0_188, %c0_189] : memref<2x2x1x16xf32, #tpu.memory_space<vmem>>, vector<1x1x1x16xf32>
    %244 = vector.shape_cast %243 : vector<1x1x1x16xf32> to vector<1x16xf32>
    %245 = vector.broadcast %244 : vector<1x16xf32> to vector<8x16xf32>
    %246 = arith.addf %242, %245 : vector<8x16xf32>
    %cst_190 = arith.constant dense<0.000000e+00> : vector<8x8xf32>
    %247 = tpu.matmul %232, %239, %cst_190 {dimension_numbers = #tpu.dot_dimension_numbers<[1], [1], [0], [0], [0, 0, 1, 0], [], []>} : vector<8x16xf32>, vector<8x16xf32>, vector<8x8xf32> -> vector<8x8xf32>
    %cst_191 = arith.constant 2.500000e-01 : f32
    %248 = vector.broadcast %cst_191 : f32 to vector<8x8xf32>
    %249 = arith.mulf %247, %248 : vector<8x8xf32>
    %250 = vector.broadcast %31 : vector<1x8xf32> to vector<8x8xf32>
    %251 = arith.addf %249, %250 : vector<8x8xf32>
    %c0_192 = arith.constant 0 : index
    %c2 = arith.constant 2 : index
    %c0_193 = arith.constant 0 : index
    %c0_194 = arith.constant 0 : index
    %252 = vector.load %arg24[%c0_192, %c2, %c0_193, %c0_194] : memref<1x4x8x8xf32, #tpu.memory_space<vmem>>, vector<1x1x8x8xf32>
    %253 = vector.shape_cast %252 : vector<1x1x8x8xf32> to vector<8x8xf32>
    %254 = vector.shape_cast %251 : vector<8x8xf32> to vector<1x1x8x8xf32>
    tpu.vector_store %arg24[%c0_192, %c2, %c0_193, %c0_194], %254 {strides = array<i32>} : memref<1x4x8x8xf32, #tpu.memory_space<vmem>>, vector<1x1x8x8xf32>,
    %cst_195 = arith.constant dense<0xFF800000> : vector<8xf32>
    %255 = vector.multi_reduction <maximumf>, %251, %cst_195 [1] : vector<8x8xf32> to vector<8xf32>
    %cst_196 = arith.constant 0xFF800000 : f32
    %256 = vector.broadcast %cst_196 : f32 to vector<8xf32>
    %257 = arith.maximumf %256, %255 : vector<8xf32>
    %258 = vector.shape_cast %257 : vector<8xf32> to vector<8x1xf32>
    %259 = vector.broadcast %258 : vector<8x1xf32> to vector<8x8xf32>
    %260 = arith.subf %251, %259 : vector<8x8xf32>
    %261 = math.exp %260 : vector<8x8xf32>
    %cst_197 = arith.constant dense<0.000000e+00> : vector<8xf32>
    %262 = vector.multi_reduction <add>, %261, %cst_197 [1] : vector<8x8xf32> to vector<8xf32>
    %263 = vector.shape_cast %262 : vector<8xf32> to vector<8x1xf32>
    %264 = vector.broadcast %263 : vector<8x1xf32> to vector<8x8xf32>
    %265 = arith.divf %261, %264 : vector<8x8xf32>
    %cst_198 = arith.constant dense<0.000000e+00> : vector<8x16xf32>
    %266 = tpu.matmul %265, %246, %cst_198 {dimension_numbers = #tpu.dot_dimension_numbers<[1], [0], [0], [1], [0, 0, 1, 1], [], []>} : vector<8x8xf32>, vector<8x16xf32>, vector<8x16xf32> -> vector<8x16xf32>
    %c1_199 = arith.constant 1 : index
    %c0_200 = arith.constant 0 : index
    %c0_201 = arith.constant 0 : index
    %c0_202 = arith.constant 0 : index
    %267 = vector.load %arg11[%c1_199, %c0_200, %c0_201, %c0_202] : memref<2x2x16x32xf32, #tpu.memory_space<vmem>>, vector<1x1x16x32xf32>
    %268 = vector.shape_cast %267 : vector<1x1x16x32xf32> to vector<16x32xf32>
    %cst_203 = arith.constant dense<0.000000e+00> : vector<8x32xf32>
    %269 = tpu.matmul %266, %268, %cst_203 {dimension_numbers = #tpu.dot_dimension_numbers<[1], [0], [0], [1], [0, 0, 1, 1], [], []>} : vector<8x16xf32>, vector<16x32xf32>, vector<8x32xf32> -> vector<8x32xf32>
    %c1_204 = arith.constant 1 : index
    %c1_205 = arith.constant 1 : index
    %c0_206 = arith.constant 0 : index
    %c0_207 = arith.constant 0 : index
    %270 = vector.load %arg5[%c1_204, %c1_205, %c0_206, %c0_207] : memref<2x2x32x16xf32, #tpu.memory_space<vmem>>, vector<1x1x32x16xf32>
    %271 = vector.shape_cast %270 : vector<1x1x32x16xf32> to vector<32x16xf32>
    %cst_208 = arith.constant dense<0.000000e+00> : vector<8x16xf32>
    %272 = tpu.matmul %215, %271, %cst_208 {dimension_numbers = #tpu.dot_dimension_numbers<[1], [0], [0], [1], [0, 0, 1, 1], [], []>} : vector<8x32xf32>, vector<32x16xf32>, vector<8x16xf32> -> vector<8x16xf32>
    %c1_209 = arith.constant 1 : index
    %c1_210 = arith.constant 1 : index
    %c0_211 = arith.constant 0 : index
    %c0_212 = arith.constant 0 : index
    %273 = vector.load %arg6[%c1_209, %c1_210, %c0_211, %c0_212] : memref<2x2x1x16xf32, #tpu.memory_space<vmem>>, vector<1x1x1x16xf32>
    %274 = vector.shape_cast %273 : vector<1x1x1x16xf32> to vector<1x16xf32>
    %275 = vector.broadcast %274 : vector<1x16xf32> to vector<8x16xf32>
    %276 = arith.addf %272, %275 : vector<8x16xf32>
    %c1_213 = arith.constant 1 : index
    %c1_214 = arith.constant 1 : index
    %c0_215 = arith.constant 0 : index
    %c0_216 = arith.constant 0 : index
    %277 = vector.load %arg7[%c1_213, %c1_214, %c0_215, %c0_216] : memref<2x2x32x16xf32, #tpu.memory_space<vmem>>, vector<1x1x32x16xf32>
    %278 = vector.shape_cast %277 : vector<1x1x32x16xf32> to vector<32x16xf32>
    %cst_217 = arith.constant dense<0.000000e+00> : vector<8x16xf32>
    %279 = tpu.matmul %215, %278, %cst_217 {dimension_numbers = #tpu.dot_dimension_numbers<[1], [0], [0], [1], [0, 0, 1, 1], [], []>} : vector<8x32xf32>, vector<32x16xf32>, vector<8x16xf32> -> vector<8x16xf32>
    %c1_218 = arith.constant 1 : index
    %c1_219 = arith.constant 1 : index
    %c0_220 = arith.constant 0 : index
    %c0_221 = arith.constant 0 : index
    %280 = vector.load %arg8[%c1_218, %c1_219, %c0_220, %c0_221] : memref<2x2x1x16xf32, #tpu.memory_space<vmem>>, vector<1x1x1x16xf32>
    %281 = vector.shape_cast %280 : vector<1x1x1x16xf32> to vector<1x16xf32>
    %282 = vector.broadcast %281 : vector<1x16xf32> to vector<8x16xf32>
    %283 = arith.addf %279, %282 : vector<8x16xf32>
    %c1_222 = arith.constant 1 : index
    %c1_223 = arith.constant 1 : index
    %c0_224 = arith.constant 0 : index
    %c0_225 = arith.constant 0 : index
    %284 = vector.load %arg9[%c1_222, %c1_223, %c0_224, %c0_225] : memref<2x2x32x16xf32, #tpu.memory_space<vmem>>, vector<1x1x32x16xf32>
    %285 = vector.shape_cast %284 : vector<1x1x32x16xf32> to vector<32x16xf32>
    %cst_226 = arith.constant dense<0.000000e+00> : vector<8x16xf32>
    %286 = tpu.matmul %215, %285, %cst_226 {dimension_numbers = #tpu.dot_dimension_numbers<[1], [0], [0], [1], [0, 0, 1, 1], [], []>} : vector<8x32xf32>, vector<32x16xf32>, vector<8x16xf32> -> vector<8x16xf32>
    %c1_227 = arith.constant 1 : index
    %c1_228 = arith.constant 1 : index
    %c0_229 = arith.constant 0 : index
    %c0_230 = arith.constant 0 : index
    %287 = vector.load %arg10[%c1_227, %c1_228, %c0_229, %c0_230] : memref<2x2x1x16xf32, #tpu.memory_space<vmem>>, vector<1x1x1x16xf32>
    %288 = vector.shape_cast %287 : vector<1x1x1x16xf32> to vector<1x16xf32>
    %289 = vector.broadcast %288 : vector<1x16xf32> to vector<8x16xf32>
    %290 = arith.addf %286, %289 : vector<8x16xf32>
    %cst_231 = arith.constant dense<0.000000e+00> : vector<8x8xf32>
    %291 = tpu.matmul %276, %283, %cst_231 {dimension_numbers = #tpu.dot_dimension_numbers<[1], [1], [0], [0], [0, 0, 1, 0], [], []>} : vector<8x16xf32>, vector<8x16xf32>, vector<8x8xf32> -> vector<8x8xf32>
    %cst_232 = arith.constant 2.500000e-01 : f32
    %292 = vector.broadcast %cst_232 : f32 to vector<8x8xf32>
    %293 = arith.mulf %291, %292 : vector<8x8xf32>
    %294 = vector.broadcast %31 : vector<1x8xf32> to vector<8x8xf32>
    %295 = arith.addf %293, %294 : vector<8x8xf32>
    %c0_233 = arith.constant 0 : index
    %c3 = arith.constant 3 : index
    %c0_234 = arith.constant 0 : index
    %c0_235 = arith.constant 0 : index
    %296 = vector.load %arg24[%c0_233, %c3, %c0_234, %c0_235] : memref<1x4x8x8xf32, #tpu.memory_space<vmem>>, vector<1x1x8x8xf32>
    %297 = vector.shape_cast %296 : vector<1x1x8x8xf32> to vector<8x8xf32>
    %298 = vector.shape_cast %295 : vector<8x8xf32> to vector<1x1x8x8xf32>
    tpu.vector_store %arg24[%c0_233, %c3, %c0_234, %c0_235], %298 {strides = array<i32>} : memref<1x4x8x8xf32, #tpu.memory_space<vmem>>, vector<1x1x8x8xf32>,
    %cst_236 = arith.constant dense<0xFF800000> : vector<8xf32>
    %299 = vector.multi_reduction <maximumf>, %295, %cst_236 [1] : vector<8x8xf32> to vector<8xf32>
    %cst_237 = arith.constant 0xFF800000 : f32
    %300 = vector.broadcast %cst_237 : f32 to vector<8xf32>
    %301 = arith.maximumf %300, %299 : vector<8xf32>
    %302 = vector.shape_cast %301 : vector<8xf32> to vector<8x1xf32>
    %303 = vector.broadcast %302 : vector<8x1xf32> to vector<8x8xf32>
    %304 = arith.subf %295, %303 : vector<8x8xf32>
    %305 = math.exp %304 : vector<8x8xf32>
    %cst_238 = arith.constant dense<0.000000e+00> : vector<8xf32>
    %306 = vector.multi_reduction <add>, %305, %cst_238 [1] : vector<8x8xf32> to vector<8xf32>
    %307 = vector.shape_cast %306 : vector<8xf32> to vector<8x1xf32>
    %308 = vector.broadcast %307 : vector<8x1xf32> to vector<8x8xf32>
    %309 = arith.divf %305, %308 : vector<8x8xf32>
    %cst_239 = arith.constant dense<0.000000e+00> : vector<8x16xf32>
    %310 = tpu.matmul %309, %290, %cst_239 {dimension_numbers = #tpu.dot_dimension_numbers<[1], [0], [0], [1], [0, 0, 1, 1], [], []>} : vector<8x8xf32>, vector<8x16xf32>, vector<8x16xf32> -> vector<8x16xf32>
    %c1_240 = arith.constant 1 : index
    %c1_241 = arith.constant 1 : index
    %c0_242 = arith.constant 0 : index
    %c0_243 = arith.constant 0 : index
    %311 = vector.load %arg11[%c1_240, %c1_241, %c0_242, %c0_243] : memref<2x2x16x32xf32, #tpu.memory_space<vmem>>, vector<1x1x16x32xf32>
    %312 = vector.shape_cast %311 : vector<1x1x16x32xf32> to vector<16x32xf32>
    %cst_244 = arith.constant dense<0.000000e+00> : vector<8x32xf32>
    %313 = tpu.matmul %310, %312, %cst_244 {dimension_numbers = #tpu.dot_dimension_numbers<[1], [0], [0], [1], [0, 0, 1, 1], [], []>} : vector<8x16xf32>, vector<16x32xf32>, vector<8x32xf32> -> vector<8x32xf32>
    %314 = arith.addf %269, %313 : vector<8x32xf32>
    %c1_245 = arith.constant 1 : index
    %c0_246 = arith.constant 0 : index
    %c0_247 = arith.constant 0 : index
    %315 = vector.load %arg12[%c1_245, %c0_246, %c0_247] : memref<2x1x32xf32, #tpu.memory_space<vmem>>, vector<1x1x32xf32>
    %316 = vector.shape_cast %315 : vector<1x1x32xf32> to vector<1x32xf32>
    %317 = vector.broadcast %316 : vector<1x32xf32> to vector<8x32xf32>
    %318 = arith.addf %314, %317 : vector<8x32xf32>
    %319 = arith.addf %215, %318 : vector<8x32xf32>
    %c1_248 = arith.constant 1 : index
    %c0_249 = arith.constant 0 : index
    %c0_250 = arith.constant 0 : index
    %320 = vector.load %arg13[%c1_248, %c0_249, %c0_250] : memref<2x1x32xf32, #tpu.memory_space<vmem>>, vector<1x1x32xf32>
    %321 = vector.shape_cast %320 : vector<1x1x32xf32> to vector<1x32xf32>
    %c1_251 = arith.constant 1 : index
    %c0_252 = arith.constant 0 : index
    %c0_253 = arith.constant 0 : index
    %322 = vector.load %arg14[%c1_251, %c0_252, %c0_253] : memref<2x1x32xf32, #tpu.memory_space<vmem>>, vector<1x1x32xf32>
    %323 = vector.shape_cast %322 : vector<1x1x32xf32> to vector<1x32xf32>
    %cst_254 = arith.constant dense<0.000000e+00> : vector<8xf32>
    %324 = vector.multi_reduction <add>, %319, %cst_254 [1] : vector<8x32xf32> to vector<8xf32>
    %325 = vector.shape_cast %324 : vector<8xf32> to vector<8x1xf32>
    %cst_255 = arith.constant 3.200000e+01 : f32
    %326 = vector.broadcast %cst_255 : f32 to vector<8x1xf32>
    %327 = arith.divf %325, %326 : vector<8x1xf32>
    %328 = vector.broadcast %327 : vector<8x1xf32> to vector<8x32xf32>
    %329 = arith.subf %319, %328 : vector<8x32xf32>
    %330 = arith.mulf %329, %329 : vector<8x32xf32>
    %cst_256 = arith.constant dense<0.000000e+00> : vector<8xf32>
    %331 = vector.multi_reduction <add>, %330, %cst_256 [1] : vector<8x32xf32> to vector<8xf32>
    %332 = vector.shape_cast %331 : vector<8xf32> to vector<8x1xf32>
    %cst_257 = arith.constant 3.200000e+01 : f32
    %333 = vector.broadcast %cst_257 : f32 to vector<8x1xf32>
    %334 = arith.divf %332, %333 : vector<8x1xf32>
    %335 = vector.broadcast %327 : vector<8x1xf32> to vector<8x32xf32>
    %336 = arith.subf %319, %335 : vector<8x32xf32>
    %cst_258 = arith.constant 9.99999996E-13 : f32
    %337 = vector.broadcast %cst_258 : f32 to vector<8x1xf32>
    %338 = arith.addf %334, %337 : vector<8x1xf32>
    %339 = math.rsqrt %338 : vector<8x1xf32>
    %340 = vector.broadcast %339 : vector<8x1xf32> to vector<8x32xf32>
    %341 = arith.mulf %336, %340 : vector<8x32xf32>
    %342 = vector.broadcast %321 : vector<1x32xf32> to vector<8x32xf32>
    %343 = arith.mulf %341, %342 : vector<8x32xf32>
    %344 = vector.broadcast %323 : vector<1x32xf32> to vector<8x32xf32>
    %345 = arith.addf %343, %344 : vector<8x32xf32>
    %c1_259 = arith.constant 1 : index
    %c0_260 = arith.constant 0 : index
    %c0_261 = arith.constant 0 : index
    %346 = vector.load %arg15[%c1_259, %c0_260, %c0_261] : memref<2x32x64xf32, #tpu.memory_space<vmem>>, vector<1x32x64xf32>
    %347 = vector.shape_cast %346 : vector<1x32x64xf32> to vector<32x64xf32>
    %cst_262 = arith.constant dense<0.000000e+00> : vector<8x64xf32>
    %348 = tpu.matmul %345, %347, %cst_262 {dimension_numbers = #tpu.dot_dimension_numbers<[1], [0], [0], [1], [0, 0, 1, 1], [], []>} : vector<8x32xf32>, vector<32x64xf32>, vector<8x64xf32> -> vector<8x64xf32>
    %c1_263 = arith.constant 1 : index
    %c0_264 = arith.constant 0 : index
    %c0_265 = arith.constant 0 : index
    %349 = vector.load %arg16[%c1_263, %c0_264, %c0_265] : memref<2x1x64xf32, #tpu.memory_space<vmem>>, vector<1x1x64xf32>
    %350 = vector.shape_cast %349 : vector<1x1x64xf32> to vector<1x64xf32>
    %351 = vector.broadcast %350 : vector<1x64xf32> to vector<8x64xf32>
    %352 = arith.addf %348, %351 : vector<8x64xf32>
    %cst_266 = arith.constant 5.000000e-01 : f32
    %353 = vector.broadcast %cst_266 : f32 to vector<8x64xf32>
    %354 = arith.mulf %353, %352 : vector<8x64xf32>
    %cst_267 = arith.constant 4.471500e-02 : f32
    %355 = vector.broadcast %cst_267 : f32 to vector<8x64xf32>
    %356 = arith.mulf %355, %352 : vector<8x64xf32>
    %357 = arith.mulf %356, %352 : vector<8x64xf32>
    %358 = arith.mulf %357, %352 : vector<8x64xf32>
    %359 = arith.addf %352, %358 : vector<8x64xf32>
    %cst_268 = arith.constant 0.797884583 : f32
    %360 = vector.broadcast %cst_268 : f32 to vector<8x64xf32>
    %361 = arith.mulf %360, %359 : vector<8x64xf32>
    %362 = math.tanh %361 : vector<8x64xf32>
    %cst_269 = arith.constant 1.000000e+00 : f32
    %363 = vector.broadcast %cst_269 : f32 to vector<8x64xf32>
    %364 = arith.addf %363, %362 : vector<8x64xf32>
    %365 = arith.mulf %354, %364 : vector<8x64xf32>
    %c1_270 = arith.constant 1 : index
    %c0_271 = arith.constant 0 : index
    %c0_272 = arith.constant 0 : index
    %366 = vector.load %arg17[%c1_270, %c0_271, %c0_272] : memref<2x64x32xf32, #tpu.memory_space<vmem>>, vector<1x64x32xf32>
    %367 = vector.shape_cast %366 : vector<1x64x32xf32> to vector<64x32xf32>
    %cst_273 = arith.constant dense<0.000000e+00> : vector<8x32xf32>
    %368 = tpu.matmul %365, %367, %cst_273 {dimension_numbers = #tpu.dot_dimension_numbers<[1], [0], [0], [1], [0, 0, 1, 1], [], []>} : vector<8x64xf32>, vector<64x32xf32>, vector<8x32xf32> -> vector<8x32xf32>
    %c1_274 = arith.constant 1 : index
    %c0_275 = arith.constant 0 : index
    %c0_276 = arith.constant 0 : index
    %369 = vector.load %arg18[%c1_274, %c0_275, %c0_276] : memref<2x1x32xf32, #tpu.memory_space<vmem>>, vector<1x1x32xf32>
    %370 = vector.shape_cast %369 : vector<1x1x32xf32> to vector<1x32xf32>
    %371 = vector.broadcast %370 : vector<1x32xf32> to vector<8x32xf32>
    %372 = arith.addf %368, %371 : vector<8x32xf32>
    %373 = arith.addf %345, %372 : vector<8x32xf32>
    %c1_277 = arith.constant 1 : index
    %c0_278 = arith.constant 0 : index
    %c0_279 = arith.constant 0 : index
    %374 = vector.load %arg19[%c1_277, %c0_278, %c0_279] : memref<2x1x32xf32, #tpu.memory_space<vmem>>, vector<1x1x32xf32>
    %375 = vector.shape_cast %374 : vector<1x1x32xf32> to vector<1x32xf32>
    %c1_280 = arith.constant 1 : index
    %c0_281 = arith.constant 0 : index
    %c0_282 = arith.constant 0 : index
    %376 = vector.load %arg20[%c1_280, %c0_281, %c0_282] : memref<2x1x32xf32, #tpu.memory_space<vmem>>, vector<1x1x32xf32>
    %377 = vector.shape_cast %376 : vector<1x1x32xf32> to vector<1x32xf32>
    %cst_283 = arith.constant dense<0.000000e+00> : vector<8xf32>
    %378 = vector.multi_reduction <add>, %373, %cst_283 [1] : vector<8x32xf32> to vector<8xf32>
    %379 = vector.shape_cast %378 : vector<8xf32> to vector<8x1xf32>
    %cst_284 = arith.constant 3.200000e+01 : f32
    %380 = vector.broadcast %cst_284 : f32 to vector<8x1xf32>
    %381 = arith.divf %379, %380 : vector<8x1xf32>
    %382 = vector.broadcast %381 : vector<8x1xf32> to vector<8x32xf32>
    %383 = arith.subf %373, %382 : vector<8x32xf32>
    %384 = arith.mulf %383, %383 : vector<8x32xf32>
    %cst_285 = arith.constant dense<0.000000e+00> : vector<8xf32>
    %385 = vector.multi_reduction <add>, %384, %cst_285 [1] : vector<8x32xf32> to vector<8xf32>
    %386 = vector.shape_cast %385 : vector<8xf32> to vector<8x1xf32>
    %cst_286 = arith.constant 3.200000e+01 : f32
    %387 = vector.broadcast %cst_286 : f32 to vector<8x1xf32>
    %388 = arith.divf %386, %387 : vector<8x1xf32>
    %389 = vector.broadcast %381 : vector<8x1xf32> to vector<8x32xf32>
    %390 = arith.subf %373, %389 : vector<8x32xf32>
    %cst_287 = arith.constant 9.99999996E-13 : f32
    %391 = vector.broadcast %cst_287 : f32 to vector<8x1xf32>
    %392 = arith.addf %388, %391 : vector<8x1xf32>
    %393 = math.rsqrt %392 : vector<8x1xf32>
    %394 = vector.broadcast %393 : vector<8x1xf32> to vector<8x32xf32>
    %395 = arith.mulf %390, %394 : vector<8x32xf32>
    %396 = vector.broadcast %375 : vector<1x32xf32> to vector<8x32xf32>
    %397 = arith.mulf %395, %396 : vector<8x32xf32>
    %398 = vector.broadcast %377 : vector<1x32xf32> to vector<8x32xf32>
    %399 = arith.addf %397, %398 : vector<8x32xf32>
    %c2_288 = arith.constant 2 : index
    %c0_289 = arith.constant 0 : index
    %c0_290 = arith.constant 0 : index
    %400 = vector.load %arg21[%c2_288, %c0_289, %c0_290] : memref<3x32x48xf32, #tpu.memory_space<vmem>>, vector<1x32x48xf32>
    %401 = vector.shape_cast %400 : vector<1x32x48xf32> to vector<32x48xf32>
    %cst_291 = arith.constant dense<0.000000e+00> : vector<8x48xf32>
    %402 = tpu.matmul %399, %401, %cst_291 {dimension_numbers = #tpu.dot_dimension_numbers<[1], [0], [0], [1], [0, 0, 1, 1], [], []>} : vector<8x32xf32>, vector<32x48xf32>, vector<8x48xf32> -> vector<8x48xf32>
    %c2_292 = arith.constant 2 : index
    %c0_293 = arith.constant 0 : index
    %c0_294 = arith.constant 0 : index
    %403 = vector.load %arg22[%c2_292, %c0_293, %c0_294] : memref<3x1x48xf32, #tpu.memory_space<vmem>>, vector<1x1x48xf32>
    %404 = vector.shape_cast %403 : vector<1x1x48xf32> to vector<1x48xf32>
    %405 = vector.broadcast %404 : vector<1x48xf32> to vector<8x48xf32>
    %406 = arith.addf %402, %405 : vector<8x48xf32>
    %c0_295 = arith.constant 0 : index
    %c2_296 = arith.constant 2 : index
    %c0_297 = arith.constant 0 : index
    %c0_298 = arith.constant 0 : index
    %407 = vector.load %arg25[%c0_295, %c2_296, %c0_297, %c0_298] : memref<1x3x8x48xf32, #tpu.memory_space<vmem>>, vector<1x1x8x48xf32>
    %408 = vector.shape_cast %407 : vector<1x1x8x48xf32> to vector<8x48xf32>
    %409 = vector.shape_cast %406 : vector<8x48xf32> to vector<1x1x8x48xf32>
    tpu.vector_store %arg25[%c0_295, %c2_296, %c0_297, %c0_298], %409 {strides = array<i32>} : memref<1x3x8x48xf32, #tpu.memory_space<vmem>>, vector<1x1x8x48xf32>,
    %c0_299 = arith.constant 0 : index
    %c0_300 = arith.constant 0 : index
    %c0_301 = arith.constant 0 : index
    %410 = vector.load %arg23[%c0_299, %c0_300, %c0_301] : memref<1x8x32xf32, #tpu.memory_space<vmem>>, vector<1x8x32xf32>
    %411 = vector.shape_cast %410 : vector<1x8x32xf32> to vector<8x32xf32>
    %412 = vector.shape_cast %399 : vector<8x32xf32> to vector<1x8x32xf32>
    tpu.vector_store %arg23[%c0_299, %c0_300, %c0_301], %412 {strides = array<i32>} : memref<1x8x32xf32, #tpu.memory_space<vmem>>, vector<1x8x32xf32>,
    return
  }
  func.func @transform_0(%arg0: i32) -> (i32, i32, i32) {
    %c0_i32 = arith.constant 0 : i32
    %c0_i32_0 = arith.constant 0 : i32
    %c0_i32_1 = arith.constant 0 : i32
    return %arg0, %c0_i32, %c0_i32_0 : i32, i32, i32
  }
  func.func @transform_1(%arg0: i32) -> (i32, i32, i32) {
    %c0_i32 = arith.constant 0 : i32
    %c0_i32_0 = arith.constant 0 : i32
    %c0_i32_1 = arith.constant 0 : i32
    return %arg0, %c0_i32, %c0_i32_0 : i32, i32, i32
  }
  func.func @transform_2(%arg0: i32) -> (i32, i32) {
    %c0_i32 = arith.constant 0 : i32
    %c0_i32_0 = arith.constant 0 : i32
    %c0_i32_1 = arith.constant 0 : i32
    return %c0_i32, %c0_i32_0 : i32, i32
  }
  func.func @transform_3(%arg0: i32) -> (i32, i32) {
    %c0_i32 = arith.constant 0 : i32
    %c0_i32_0 = arith.constant 0 : i32
    %c0_i32_1 = arith.constant 0 : i32
    return %c0_i32, %c0_i32_0 : i32, i32
  }
  func.func @transform_4(%arg0: i32) -> (i32, i32, i32, i32) {
    %c0_i32 = arith.constant 0 : i32
    %c0_i32_0 = arith.constant 0 : i32
    %c0_i32_1 = arith.constant 0 : i32
    %c0_i32_2 = arith.constant 0 : i32
    %c0_i32_3 = arith.constant 0 : i32
    return %c0_i32, %c0_i32_0, %c0_i32_1, %c0_i32_2 : i32, i32, i32, i32
  }
  func.func @transform_5(%arg0: i32) -> (i32, i32, i32, i32) {
    %c0_i32 = arith.constant 0 : i32
    %c0_i32_0 = arith.constant 0 : i32
    %c0_i32_1 = arith.constant 0 : i32
    %c0_i32_2 = arith.constant 0 : i32
    %c0_i32_3 = arith.constant 0 : i32
    return %c0_i32, %c0_i32_0, %c0_i32_1, %c0_i32_2 : i32, i32, i32, i32
  }
  func.func @transform_6(%arg0: i32) -> (i32, i32, i32, i32) {
    %c0_i32 = arith.constant 0 : i32
    %c0_i32_0 = arith.constant 0 : i32
    %c0_i32_1 = arith.constant 0 : i32
    %c0_i32_2 = arith.constant 0 : i32
    %c0_i32_3 = arith.constant 0 : i32
    return %c0_i32, %c0_i32_0, %c0_i32_1, %c0_i32_2 : i32, i32, i32, i32
  }
  func.func @transform_7(%arg0: i32) -> (i32, i32, i32, i32) {
    %c0_i32 = arith.constant 0 : i32
    %c0_i32_0 = arith.constant 0 : i32
    %c0_i32_1 = arith.constant 0 : i32
    %c0_i32_2 = arith.constant 0 : i32
    %c0_i32_3 = arith.constant 0 : i32
    return %c0_i32, %c0_i32_0, %c0_i32_1, %c0_i32_2 : i32, i32, i32, i32
  }
  func.func @transform_8(%arg0: i32) -> (i32, i32, i32, i32) {
    %c0_i32 = arith.constant 0 : i32
    %c0_i32_0 = arith.constant 0 : i32
    %c0_i32_1 = arith.constant 0 : i32
    %c0_i32_2 = arith.constant 0 : i32
    %c0_i32_3 = arith.constant 0 : i32
    return %c0_i32, %c0_i32_0, %c0_i32_1, %c0_i32_2 : i32, i32, i32, i32
  }
  func.func @transform_9(%arg0: i32) -> (i32, i32, i32, i32) {
    %c0_i32 = arith.constant 0 : i32
    %c0_i32_0 = arith.constant 0 : i32
    %c0_i32_1 = arith.constant 0 : i32
    %c0_i32_2 = arith.constant 0 : i32
    %c0_i32_3 = arith.constant 0 : i32
    return %c0_i32, %c0_i32_0, %c0_i32_1, %c0_i32_2 : i32, i32, i32, i32
  }
  func.func @transform_10(%arg0: i32) -> (i32, i32, i32, i32) {
    %c0_i32 = arith.constant 0 : i32
    %c0_i32_0 = arith.constant 0 : i32
    %c0_i32_1 = arith.constant 0 : i32
    %c0_i32_2 = arith.constant 0 : i32
    %c0_i32_3 = arith.constant 0 : i32
    return %c0_i32, %c0_i32_0, %c0_i32_1, %c0_i32_2 : i32, i32, i32, i32
  }
  func.func @transform_11(%arg0: i32) -> (i32, i32, i32) {
    %c0_i32 = arith.constant 0 : i32
    %c0_i32_0 = arith.constant 0 : i32
    %c0_i32_1 = arith.constant 0 : i32
    %c0_i32_2 = arith.constant 0 : i32
    return %c0_i32, %c0_i32_0, %c0_i32_1 : i32, i32, i32
  }
  func.func @transform_12(%arg0: i32) -> (i32, i32, i32) {
    %c0_i32 = arith.constant 0 : i32
    %c0_i32_0 = arith.constant 0 : i32
    %c0_i32_1 = arith.constant 0 : i32
    %c0_i32_2 = arith.constant 0 : i32
    return %c0_i32, %c0_i32_0, %c0_i32_1 : i32, i32, i32
  }
  func.func @transform_13(%arg0: i32) -> (i32, i32, i32) {
    %c0_i32 = arith.constant 0 : i32
    %c0_i32_0 = arith.constant 0 : i32
    %c0_i32_1 = arith.constant 0 : i32
    %c0_i32_2 = arith.constant 0 : i32
    return %c0_i32, %c0_i32_0, %c0_i32_1 : i32, i32, i32
  }
  func.func @transform_14(%arg0: i32) -> (i32, i32, i32) {
    %c0_i32 = arith.constant 0 : i32
    %c0_i32_0 = arith.constant 0 : i32
    %c0_i32_1 = arith.constant 0 : i32
    %c0_i32_2 = arith.constant 0 : i32
    return %c0_i32, %c0_i32_0, %c0_i32_1 : i32, i32, i32
  }
  func.func @transform_15(%arg0: i32) -> (i32, i32, i32) {
    %c0_i32 = arith.constant 0 : i32
    %c0_i32_0 = arith.constant 0 : i32
    %c0_i32_1 = arith.constant 0 : i32
    %c0_i32_2 = arith.constant 0 : i32
    return %c0_i32, %c0_i32_0, %c0_i32_1 : i32, i32, i32
  }
  func.func @transform_16(%arg0: i32) -> (i32, i32, i32) {
    %c0_i32 = arith.constant 0 : i32
    %c0_i32_0 = arith.constant 0 : i32
    %c0_i32_1 = arith.constant 0 : i32
    %c0_i32_2 = arith.constant 0 : i32
    return %c0_i32, %c0_i32_0, %c0_i32_1 : i32, i32, i32
  }
  func.func @transform_17(%arg0: i32) -> (i32, i32, i32) {
    %c0_i32 = arith.constant 0 : i32
    %c0_i32_0 = arith.constant 0 : i32
    %c0_i32_1 = arith.constant 0 : i32
    %c0_i32_2 = arith.constant 0 : i32
    return %c0_i32, %c0_i32_0, %c0_i32_1 : i32, i32, i32
  }
  func.func @transform_18(%arg0: i32) -> (i32, i32, i32) {
    %c0_i32 = arith.constant 0 : i32
    %c0_i32_0 = arith.constant 0 : i32
    %c0_i32_1 = arith.constant 0 : i32
    %c0_i32_2 = arith.constant 0 : i32
    return %c0_i32, %c0_i32_0, %c0_i32_1 : i32, i32, i32
  }
  func.func @transform_19(%arg0: i32) -> (i32, i32, i32) {
    %c0_i32 = arith.constant 0 : i32
    %c0_i32_0 = arith.constant 0 : i32
    %c0_i32_1 = arith.constant 0 : i32
    %c0_i32_2 = arith.constant 0 : i32
    return %c0_i32, %c0_i32_0, %c0_i32_1 : i32, i32, i32
  }
  func.func @transform_20(%arg0: i32) -> (i32, i32, i32) {
    %c0_i32 = arith.constant 0 : i32
    %c0_i32_0 = arith.constant 0 : i32
    %c0_i32_1 = arith.constant 0 : i32
    %c0_i32_2 = arith.constant 0 : i32
    return %c0_i32, %c0_i32_0, %c0_i32_1 : i32, i32, i32
  }
  func.func @transform_21(%arg0: i32) -> (i32, i32, i32) {
    %c0_i32 = arith.constant 0 : i32
    %c0_i32_0 = arith.constant 0 : i32
    %c0_i32_1 = arith.constant 0 : i32
    %c0_i32_2 = arith.constant 0 : i32
    return %c0_i32, %c0_i32_0, %c0_i32_1 : i32, i32, i32
  }
  func.func @transform_22(%arg0: i32) -> (i32, i32, i32) {
    %c0_i32 = arith.constant 0 : i32
    %c0_i32_0 = arith.constant 0 : i32
    %c0_i32_1 = arith.constant 0 : i32
    return %arg0, %c0_i32, %c0_i32_0 : i32, i32, i32
  }
  func.func @transform_23(%arg0: i32) -> (i32, i32, i32, i32) {
    %c0_i32 = arith.constant 0 : i32
    %c0_i32_0 = arith.constant 0 : i32
    %c0_i32_1 = arith.constant 0 : i32
    %c0_i32_2 = arith.constant 0 : i32
    return %arg0, %c0_i32, %c0_i32_0, %c0_i32_1 : i32, i32, i32, i32
  }
  func.func @transform_24(%arg0: i32) -> (i32, i32, i32, i32) {
    %c0_i32 = arith.constant 0 : i32
    %c0_i32_0 = arith.constant 0 : i32
    %c0_i32_1 = arith.constant 0 : i32
    %c0_i32_2 = arith.constant 0 : i32
    return %arg0, %c0_i32, %c0_i32_0, %c0_i32_1 : i32, i32, i32, i32
  }
}

</mosaic_0001>

<bundles_post_ra>
// kernel: tiny_bert_forward.1
= control target key start
LH: loop header
LB: loop body
LE: loop exit
PB: predicated region body
PF: predicated region fallthrough
CT: control target
= control target key end

     0   :  { %s5367_s0 = inlined_call_operand.vmem [shape: f32[2,8,32], index: 0, kind: input, shape index: {}]   ;;  %s5368_s1 = inlined_call_operand.vmem [shape: f32[2,1,8], index: 1, kind: input, shape index: {}]   ;;  %s5369_s2 = inlined_call_operand.vmem [shape: f32[1,32], index: 2, kind: input, shape index: {}]   ;;  %s5370_s3 = inlined_call_operand.vmem [shape: f32[1,32], index: 3, kind: input, shape index: {}]   ;;  %s5371_s4 = inlined_call_operand.vmem [shape: f32[2,2,32,16], index: 4, kind: input, shape index: {}]   ;;  %s5372_s5 = inlined_call_operand.vmem [shape: f32[2,2,1,16], index: 5, kind: input, shape index: {}]   ;;  %s5373_s6 = inlined_call_operand.vmem [shape: f32[2,2,32,16], index: 6, kind: input, shape index: {}]   ;;  %s5374_s7 = inlined_call_operand.vmem [shape: f32[2,2,1,16], index: 7, kind: input, shape index: {}]   ;;  %s5375_s8 = inlined_call_operand.vmem [shape: f32[2,2,32,16], index: 8, kind: input, shape index: {}]   ;;  %s5376_s9 = inlined_call_operand.vmem [shape: f32[2,2,1,16], index: 9, kind: input, shape index: {}]   ;;  %s5377_s10 = inlined_call_operand.vmem [shape: f32[2,2,16,32], index: 10, kind: input, shape index: {}]   ;;  %s5378_s11 = inlined_call_operand.vmem [shape: f32[2,1,32], index: 11, kind: input, shape index: {}]   ;;  %s5379_s12 = inlined_call_operand.vmem [shape: f32[2,1,32], index: 12, kind: input, shape index: {}]   ;;  %s5380_s13 = inlined_call_operand.vmem [shape: f32[2,1,32], index: 13, kind: input, shape index: {}]   ;;  %s5381_s14 = inlined_call_operand.vmem [shape: f32[2,32,64], index: 14, kind: input, shape index: {}]   ;;  %s5382_s15 = inlined_call_operand.vmem [shape: f32[2,1,64], index: 15, kind: input, shape index: {}]   ;;  %s5383_s16 = inlined_call_operand.vmem [shape: f32[2,64,32], index: 16, kind: input, shape index: {}]   ;;  %s5384_s17 = inlined_call_operand.vmem [shape: f32[2,1,32], index: 17, kind: input, shape index: {}]   ;;  %s5385_s18 = inlined_call_operand.vmem [shape: f32[2,1,32], index: 18, kind: input, shape index: {}]   ;;  %s5386_s19 = inlined_call_operand.vmem [shape: f32[2,1,32], index: 19, kind: input, shape index: {}]   ;;  %s5387_s20 = inlined_call_operand.vmem [shape: f32[3,32,48], index: 20, kind: input, shape index: {}]   ;;  %s5388_s21 = inlined_call_operand.vmem [shape: f32[3,1,48], index: 21, kind: input, shape index: {}]   ;;  %s5389_s22 = inlined_call_operand.hbm [shape: f32[2,8,32], index: 22, kind: output, shape index: {0}]   ;;  %s5390_s23 = inlined_call_operand.vmem [shape: f32[2,4,8,8], index: 23, kind: output, shape index: {1}]   ;;  %s5391_s24 = inlined_call_operand.vmem [shape: f32[2,3,8,48], index: 24, kind: output, shape index: {2}]  }
   0x1   :  { %5412 = sst [smem:[#allocation14_spill]] %s5367_s0 }
   0x2   :  { %5413 = sst [smem:[#allocation15_spill]] %s5368_s1 }
   0x3   :  { %5414 = sst [smem:[#allocation16_spill]] %s5369_s2 }
   0x4   :  { %5415 = sst [smem:[#allocation17_spill]] %s5370_s3 }
   0x5   :  { %5416 = sst [smem:[#allocation18_spill]] %s5371_s4 }
   0x6   :  { %5417 = sst [smem:[#allocation19_spill]] %s5372_s5 }
   0x7   :  { %5418 = sst [smem:[#allocation20_spill]] %s5373_s6 }
   0x8   :  { %5419 = sst [smem:[#allocation21_spill]] %s5374_s7 }
   0x9   :  { %5420 = sst [smem:[#allocation22_spill]] %s5375_s8 }
   0xa   :  { %5421 = sst [smem:[#allocation23_spill]] %s5376_s9 }
   0xb   :  { %5422 = sst [smem:[#allocation24_spill]] %s5388_s21 }
   0xc   :  { %5423 = sst [smem:[#allocation25_spill]] %s5389_s22 }
   0xd   :  { %5424 = sst [smem:[#allocation26_spill]] %s5391_s24 }
   0xe   :  { %30 = vsyncpa [#allocation3], 0 }
   0xf   :  { %32 = vsyncpa [#allocation3 + $0x1], 0  ;;  %s4675_s5 = smov 0   ;;  %s4677_s26 = smov 0  }
  0x10   :  { %s4679_s27 = smov 0   ;;  %s4681_s28 = smov 0  }
  0x11 LB: > { %5425 = sst [smem:[#allocation5_spill]] %s4532_s5  ;;  %s4696_s6 = sadd.s32 4294967295, %s4544_s28   ;;  %s4544_s28 = sphi %s4681_s28, %s5457_s28   ;;  %s4540_s27 = sphi %s4679_s27, %s5460_s27   ;;  %s4536_s26 = sphi %s4677_s26, %s5459_s26   ;;  %s4532_s5 = sphi %s4675_s5, %s5458_s5  }
  0x12   : > { %5426 = sst [smem:[#allocation6_spill]] %s4536_s26  ;;  %s3682_s2 = sadd.s32 4294967294, %s4544_s28  }
  0x13   : > { %5427 = sst [smem:[#allocation7_spill]] %s4540_s27  ;;  %s4700_s29 = sadd.s32 1, %s4544_s28  }
  0x14   : > { %5428 = sst [smem:[#allocation8_spill]] %s4544_s28  ;;  %s517_s0 = sadd.s32 1, %s4540_s27 }
  0x15   : > { %5429 = sst [smem:[#allocation9_spill]] %s4696_s6  ;;  %s514_s7 = ssub.s32 %s4544_s28, %s4700_s29 }
  0x16   : > { %5430 = sst [smem:[#allocation10_spill]] %s4700_s29  ;;  %p527_p0 = scmp.ne.s32.totalorder %s4540_s27, %s4536_s26 }
  0x17   : > { %p515_p1 = scmp.eq.s32.totalorder %s514_s7, 0  ;;  %p528_p2 = scmp.eq.s32.totalorder %s4696_s6, 1 }
  0x18   : > { %p533_p3 = scmp.ne.s32.totalorder %s4536_s26, %s4532_s5  ;;  %p534_p4 = scmp.eq.s32.totalorder %s3682_s2, 1 }
  0x19   : > { %s4711_s30 = scalar_select %p515_p1, %s4540_s27, %s517_s0  }
  0x1a   : > { %p4713_p5 = por %p528_p2, %p527_p0  ;;  %p4717_p6 = por %p534_p4, %p533_p3 }
  0x1b   : > { %5431 = sst [smem:[#allocation11_spill]] %s4711_s30  ;;  %p3685_p7 = scmp.ge.s32.totalorder %s4544_s28, 1 }
  0x1c   : > { %s5432_s3 = scalar_select %p4713_p5, 1, 0 }
  0x1d   : > { %s5434_s25 = scalar_select %p4717_p6, 1, 0 }
  0x1e   : > { %5433 = sst [smem:[#allocation12_spill]] %s5432_s3  ;;  %p677_p8 = scmp.lt.s32.totalorder %s4544_s28, 3 }
  0x1f   : > { %5435 = sst [smem:[#allocation13_spill]] %s5434_s25 }
  0x20   : > { %p678_p9 = pnand %p3685_p7, %p677_p8 }
  0x21   : > { %p755_p10 = scmp.lt.s32.totalorder (!%p678_p9), %s4696_s6, 1  ;;  %vm775_vm0 = vcmask (!%p678_p9), 261120   ;;  %s5436_s0 = sld [smem:[#allocation14_spill]] (!%p678_p9)  ;;  %v807_v7 = vld [vmem:[%s5387_s20] sm:$0xff] (!%p678_p9)  ;;  %v808_v8 = vld [vmem:[%s5387_s20 + $0x8] sm:$0xff] (!%p678_p9)  ;;  %v4546_v12 = vmov (!%p678_p9), 0.0|0.0  }
  0x22   : > { %681 = sbr.rel (%p678_p9) target bundleno = 6613 (0x19d5), region = 108  ;;  %s5437_s2 = sld [smem:[#allocation18_spill]] (!%p678_p9)  ;;  %v4272_v10 = vpack.c.bf16 (!%p678_p9), %v808_v8, %v807_v7  ;;  %4271 = vmatprep.subr.bf16.mxu0 (!%p678_p9), %v4546_v12  ;;  %4277 = vmatprep.subr.bf16.mxu1 (!%p678_p9), %v4546_v12  ;;  %v809_v14 = vld [vmem:[%s5387_s20 + $0x10] sm:$0xff] (!%p678_p9)  ;;  %v810_v15 = vld [vmem:[%s5387_s20 + $0x18] sm:$0xff] (!%p678_p9)  ;;  %vm4547_vm1 = vmmov (!%p678_p9), 0   ;;  %v4548_v20 = vmov (!%p678_p9), 0.0  }
  0x23   : > { %v4275_v17 = vpack.c.bf16 (!%p678_p9), %v810_v15, %v809_v14  ;;  %3986 = vmatprep.mubr.msk.f32.mxu0 (!%p678_p9), %vm4547_vm1, %v4548_v20  ;;  %3997 = vmatprep.mubr.msk.f32.mxu1 (!%p678_p9), %vm4547_vm1, %v4548_v20  ;;  %s5438_s30 = sld [smem:[#allocation16_spill]] (!%p678_p9)  ;;  %s5439_s1 = sld [smem:[#allocation20_spill]] (!%p678_p9)  ;;  %vm891_vm2 = vcmask (!%p678_p9), 392192   ;;  %vm1136_vm3 = vcmask (!%p678_p9), 130048   ;;  %vm1221_vm4 = vcmask (!%p678_p9), 64512  }
  0x24   : > { %4273 = vmatpush3.bf16.msra.mxu0 (!%p678_p9), %v4272_v10  ;;  %s5440_s22 = sld [smem:[#allocation22_spill]] (!%p678_p9)  ;;  %s5441_s29 = sld [smem:[#allocation17_spill]] (!%p678_p9)  ;;  %vm2017_vm5 = vcmask (!%p678_p9), 523264  }
  0x25   : > { %4274 = vmatprep.subr.bf16.mxu0 (!%p678_p9), %v4546_v12  ;;  %s5442_s21 = sld [smem:[#allocation24_spill]] (!%p678_p9)  ;;  %s5443_s24 = sld [smem:[#allocation26_spill]] (!%p678_p9) }
  0x26   : > { %s5444_s28 = sld [smem:[#allocation21_spill]] (!%p678_p9)  ;;  %s5446_s9 = sld [smem:[#allocation23_spill]] (!%p678_p9) }
  0x27   : > { %s5448_s3 = sld [smem:[#allocation15_spill]] (!%p678_p9)  ;;  %s4549_s5 = smov (!%p678_p9), [#allocation2]  }
  0x28   : > { %v893_v9 = vld [vmem:[%s5437_s2] sm:$0xff] (!%p678_p9)  ;;  %v894_v11 = vld [vmem:[%s5437_s2 + $0x8] sm:$0xff] (!%p678_p9)  ;;  %v895_v16 = vld [vmem:[%s5437_s2 + $0x10] sm:$0xff] (!%p678_p9)  ;;  %4276 = vmatpush3.bf16.msra.mxu0 (!%p678_p9), %v4275_v17 }
  0x29   : > { %s4725_s8 = scalar_select %p755_p10, %s4696_s6, 1  ;;  %v4278_v13 = vpack.c.bf16 %v894_v11, %v893_v9  ;;  %v896_v18 = vld [vmem:[%s5437_s2 + $0x18] sm:$0xff]  ;;  %4283 = vmatprep.subr.bf16.mxu0 %v4546_v12  ;;  %v3691_v25 = vld [vmem:[%s5438_s30] ss:$0 sm:$0xff]  ;;  %v975_v28 = vld [vmem:[%s5439_s1 + $0x8] sm:$0xff] }
  0x2a   : > { %v4281_v19 = vpack.c.bf16 %v896_v18, %v895_v16  ;;  %v974_v26 = vld [vmem:[%s5439_s1] sm:$0xff]  ;;  %v1056_v30 = vld [vmem:[%s5440_s22 + $0x8] sm:$0xff]  ;;  %v976_v35 = vld [vmem:[%s5439_s1 + $0x10] sm:$0xff] }
  0x2b   : > { %s3687_s4 = sshll.u32 %s4725_s8, 3  ;;  %4279 = vmatpush3.bf16.msra.mxu1 %v4278_v13  ;;  %v1055_v29 = vld [vmem:[%s5440_s22] sm:$0xff]  ;;  %v4284_v33 = vpack.c.bf16 %v975_v28, %v974_v26  ;;  %v977_v37 = vld [vmem:[%s5439_s1 + $0x18] sm:$0xff]  ;;  %v1057_v38 = vld [vmem:[%s5440_s22 + $0x10] sm:$0xff]  ;;  %s3846_s26 = sshll.u32 %s4725_s8, 5 }
  0x2c   : > { %s758_s7 = scalar_lea.vmem %s5436_s0, %s3687_s4  ;;  %4280 = vmatprep.subr.bf16.mxu1 %v4546_v12  ;;  %v3692_v31 = vld [vmem:[%s5441_s29] ss:$0 sm:$0xff]  ;;  %v4290_v34 = vpack.c.bf16 %v1056_v30, %v1055_v29  ;;  %v1058_v39 = vld [vmem:[%s5440_s22 + $0x18] sm:$0xff]  ;;  %v4287_v40 = vpack.c.bf16 %v977_v37, %v976_v35  ;;  %s4409_s0 = smul.u32 24, %s4725_s8  ;;  %v3705_v53 = vld [vmem:[%s5437_s2 + $0x28] sm:$0xff] }
  0x2d   : > { %v772_v0 = vld [vmem:[%s758_s7] sm:$0xff]  ;;  %v4293_v41 = vpack.c.bf16 %v1058_v39, %v1057_v38  ;;  %s5445_s6 = smov %s5444_s28  ;;  %v3706_v61 = vld [vmem:[%s5437_s2 + $0x30] sm:$0xff]  ;;  %v3707_v62 = vld [vmem:[%s5437_s2 + $0x38] sm:$0xff]  ;;  %s4891_s27 = scalar_lea.vmem %s5390_s23, %s3846_s26 }
  0x2e   : > { %v776_v1 = vsel %vm775_vm0, %v772_v0, 0.0  ;;  %v3693_v42 = vld [vmem:[%s5442_s21] ss:$0 sm:$0xff]  ;;  %s4826_s25 = scalar_lea.vmem %s5443_s24, %s4409_s0  ;;  %s5447_s21 = sld [smem:[#allocation19_spill]]  ;;  %v4299_v63 = vpack.c.bf16 %v3707_v62, %v3706_v61  ;;  %v3713_v35 = vld [vmem:[%s5439_s1 + $0x30] sm:$0xff]  ;;  %v3714_v37 = vld [vmem:[%s5439_s1 + $0x38] sm:$0xff] }
  0x2f   : > { %777 = vadd.xlane.f32.xlu0 %v776_v1  ;;  %4282 = vmatpush3.bf16.msra.mxu1 %v4281_v19  ;;  %v3697_v48 = vld [vmem:[%s5444_s28] ss:$0 sm:$0xff]  ;;  %v3719_v1 = vld [vmem:[%s5440_s22 + $0x28] sm:$0xff]  ;;  %s761_s24 = scalar_lea.vmem %s5448_s3, %s4725_s8  ;;  %v4305_v38 = vpack.c.bf16 %v3714_v37, %v3713_v35  ;;  %s5449_s8 = sld [smem:[#allocation24_spill]] }
  0x30   : > { %4289 = vmatprep.subr.bf16.mxu1 %v4546_v12  ;;  %v3699_v49 = vld [vmem:[%s5446_s9] ss:$0 sm:$0xff]  ;;  %s5450_s0 = sld [smem:[#allocation6_spill]]  ;;  %s5453_s7 = sld [smem:[#allocation25_spill]] }
  0x31   : > { %v3704_v52 = vld [vmem:[%s5437_s2 + $0x20] sm:$0xff] }
  0x32   : > { %v4296_v59 = vpack.c.bf16 %v3705_v53, %v3704_v52  ;;  %v804_v7 = vld [vmem:[%s761_s24] sm:$0x1]  ;;  %s5451_s24 = sld [smem:[#allocation9_spill]] }
  0x33   : > { %v805_v8 = vsub.f32 1.0, %v804_v7  ;;  %v3711_v30 = vld [vmem:[%s5439_s1 + $0x20] sm:$0xff] }
  0x34   : > { %v3695_v54 = vld [vmem:[%s5447_s21] ss:$0 sm:$0xff] }
  0x35   : > { %v806_v10 = vmul.f32 -10000.0, %v805_v8 }
  0x36   : > { %s738_s26 = sand.u32 1, %s5450_s0  }
  0x37   : > { %s3686_s4 = sshll.u32 %s738_s26, 3 }
  0x38   : > { %s740_s28 = scalar_lea.vmem [#allocation2], %s3686_s4  ;;  %s3843_s0 = sshll.u32 %s5451_s24, 7 }
  0x39   : > { %s3558_s3 = sshll.u32 %s740_s28, 4  ;;  %s5326_s29 = scalar_lea.hbm %s5453_s7, %s3843_s0  ;;  %s3559_s3 = int_to_ptr.vmem [resolvable:$true] %s3558_s3 }
  0xbc   : > { %v778_v2 = vpop.xlane.xlu0 %777 }
  0xbd   : > { %v780_v3 = vmul.f32 0.03125, %v778_v2 }
  0xbf   : > { %v781_v4 = vsub.f32 %v772_v0, %v780_v3  ;;  %v3718_v0 = vld [vmem:[%s5440_s22 + $0x20] sm:$0xff]  ;;  %v3720_v3 = vld [vmem:[%s5440_s22 + $0x30] sm:$0xff] }
  0xc0   : > { %v4308_v2 = vpack.c.bf16 %v3719_v1, %v3718_v0  ;;  %v1308_v0 = vld [vmem:[%s5377_s10 + $0x8] sm:$0xff] }
  0xc1   : > { %v782_v5 = vmul.f32 %v781_v4, %v781_v4 }
  0xc3   : > { %v783_v6 = vsel %vm775_vm0, %v782_v5, 0.0 }
  0xc4   : > { %784 = vadd.xlane.f32.xlu0 %v783_v6  ;;  %v1215_v6 = vlaneseq }
  0xc6   : > { %v1216_v9 = vshrl.u32 %v1215_v6, 7 }
  0xc8   : > { %v1217_v11 = vsub.s32 0, %v1216_v9  ;;  %v3733_v9 = vld [vmem:[%s5378_s11] ss:$0 sm:$0xff] }
  0xca   : > { %v4886_v13 = vrot.slane %v806_v10, %v1217_v11 }
 0x151   : > { %v785_v21 = vpop.xlane.xlu0 %784 }
 0x152   : > { %v786_v22 = vmul.f32 0.03125, %v785_v21 }
 0x154   : > { %v787_v23 = vadd.f32 1e-12, %v786_v22 }
 0x156   : > { %4452 = vrsqrt.f32 %v787_v23 }
 0x160   : > { %v4453_v24 = vpop.eup %4452 }
 0x161   : > { %v789_v27 = vmul.f32 %v4453_v24, %v781_v4  ;;  %v3721_v4 = vld [vmem:[%s5440_s22 + $0x38] sm:$0xff] }
 0x162   : > { %v4311_v5 = vpack.c.bf16 %v3721_v4, %v3720_v3 }
 0x163   : > { %v796_v32 = vmul.f32 %v3691_v25, %v789_v27 }
 0x165   : > { %v4788_v36 = vadd.f32 %v3692_v31, %v796_v32  ;;  %v3712_v31 = vld [vmem:[%s5439_s1 + $0x28] sm:$0xff] }
 0x167   : > { %3987 = vmatmul.mubr.msk.f32.vlgmr.msra.gmra.mrb[0].mxu0 %vm775_vm0, %v4788_v36  ;;  %3998 = vmatmul.mubr.msk.f32.vlgmr.msra.gmra.mrb[0].mxu1 %vm775_vm0, %v4788_v36 }
 0x168   : > { %4285 = vmatpush3.bf16.msra.mxu0 %v4284_v33  ;;  %4291 = vmatpush3.bf16.msra.mxu1 %v4290_v34  ;;  %v4302_v33 = vpack.c.bf16 %v3712_v31, %v3711_v30 }
 0x169   : > { %4286 = vmatprep.subr.bf16.mxu0 %v4546_v12  ;;  %4292 = vmatprep.subr.bf16.mxu1 %v4546_v12 }
 0x16a   : > { %4008 = vmatprep.mubr.msk.f32.mxu0 %vm4547_vm1, %v4548_v20  ;;  %4019 = vmatprep.mubr.msk.f32.mxu1 %vm4547_vm1, %v4548_v20 }
 0x16c   : > { %4288 = vmatpush3.bf16.msra.mxu0 %v4287_v40  ;;  %4294 = vmatpush3.bf16.msra.mxu1 %v4293_v41  ;;  %v3716_v41 = vld [vmem:[%s5445_s6 + $0x1] ss:$0 sm:$0xff] }
 0x16d   : > { %4022 = vmatprep.subr.mxu0 %v4548_v20  ;;  %4027 = vmatprep.subr.mxu1 %v4548_v20 }
 0x16f   : > { %4009 = vmatmul.mubr.msk.f32.vlgmr.msra.gmra.mrb[2].mxu0 %vm775_vm0, %v4788_v36  ;;  %4020 = vmatmul.mubr.msk.f32.vlgmr.msra.gmra.mrb[2].mxu1 %vm775_vm0, %v4788_v36 }
 0x170   : > { %4024 = vmatprep.mubr.msk.f32.mxu0 %vm4547_vm1, %v4548_v20  ;;  %4029 = vmatprep.mubr.msk.f32.mxu1 %vm4547_vm1, %v4548_v20 }
 0x23a   : > { %v887_v43 = vpop.f32.mrb[0].mxu0  ;;  %v970_v44 = vpop.f32.mrb[0].mxu1 }
 0x23b   : > { %v888_v45 = vadd.f32 %v3693_v42, %v887_v43  ;;  %v3988_v46 = vpop.f32.mrb[1].mxu0  ;;  %v3999_v47 = vpop.f32.mrb[1].mxu1  ;;  %v971_v60 = vadd.f32 %v3695_v54, %v970_v44  ;;  %v3709_v43 = vld [vmem:[%s5447_s21 + $0x1] ss:$0 sm:$0xff] }
 0x23c   : > { %v3723_v46 = vld [vmem:[%s5446_s9 + $0x1] ss:$0 sm:$0xff] }
 0x23d   : > { %892 = vst.msk [vmem:[%s4826_s25] sm:$0xff] %vm891_vm2, %v888_v45 }
 0x242   : > { %v1051_v50 = vpop.f32.mrb[2].mxu0  ;;  %v1132_v51 = vpop.f32.mrb[2].mxu1 }
 0x243   : > { %v1052_v55 = vadd.f32 %v3697_v48, %v1051_v50  ;;  %v1133_v56 = vadd.f32 %v3699_v49, %v1132_v51  ;;  %v4010_v57 = vpop.f32.mrb[3].mxu0  ;;  %v4021_v58 = vpop.f32.mrb[3].mxu1 }
 0x245   : > { %4023 = vmatpush3.xpose.msk.msra.mxu0 %vm1136_vm3, %v1052_v55  ;;  %4028 = vmatpush3.msra.mxu1 %v1133_v56 }
 0x246   : > { %4295 = vmatprep.subr.bf16.mxu0 %v4546_v12  ;;  %4301 = vmatprep.subr.bf16.mxu1 %v4546_v12 }
 0x248   : > { %4025 = vmatmul.mubr.msk.f32.vlgmr.msra.gmra.mrb[4].mxu0 %vm1136_vm3, %v971_v60  ;;  %v3730_v60 = vld [vmem:[%s5377_s10 + $0x18] sm:$0xff] }
 0x249   : > { %4297 = vmatpush3.bf16.msra.mxu0 %v4296_v59  ;;  %4040 = vmatprep.mubr.msk.f32.mxu0 %vm4547_vm1, %v4548_v20  ;;  %v3729_v59 = vld [vmem:[%s5377_s10 + $0x10] sm:$0xff] }
 0x24a   : > { %4298 = vmatprep.subr.bf16.mxu0 %v4546_v12  ;;  %v4314_v61 = vpack.c.bf16 %v3730_v60, %v3729_v59 }
 0x24d   : > { %4300 = vmatpush3.bf16.msra.mxu0 %v4299_v63  ;;  %v1307_v63 = vld [vmem:[%s5377_s10] sm:$0xff] }
 0x24e   : > { %4307 = vmatprep.subr.bf16.mxu0 %v4546_v12 }
 0x250   : > { %4041 = vmatmul.mubr.msk.f32.vlgmr.msra.gmra.mrb[6].mxu0 %vm775_vm0, %v4788_v36 }
 0x251   : > { %4309 = vmatpush3.bf16.msra.mxu0 %v4308_v2  ;;  %4062 = vmatprep.mubr.msk.f32.mxu0 %vm4547_vm1, %v4548_v20  ;;  %v4317_v2 = vpack.c.bf16 %v1308_v0, %v1307_v63  ;;  %v3738_v63 = vld [vmem:[%s5384_s17] ss:$0 sm:$0xff] }
 0x252   : > { %4310 = vmatprep.subr.bf16.mxu0 %v4546_v12 }
 0x255   : > { %4312 = vmatpush3.bf16.msra.mxu0 %v4311_v5 }
 0x256   : > { %4313 = vmatprep.subr.bf16.mxu0 %v4546_v12 }
 0x258   : > { %4063 = vmatmul.mubr.msk.f32.vlgmr.msra.gmra.mrb[8].mxu0 %vm775_vm0, %v4788_v36 }
 0x259   : > { %4079 = vmatprep.mubr.msk.f32.mxu0 %vm4547_vm1, %v4548_v20  ;;  %4315 = vmatpush3.bf16.msra.mxu0 %v4314_v61 }
 0x25a   : > { %4319 = vmatprep.subr.bf16.mxu0 %v4546_v12 }
 0x31b   : > { %v1209_v14 = vpop.f32.mrb[4].mxu0 }
 0x31c   : > { %v1213_v15 = vmul.f32 0.25, %v1209_v14  ;;  %v4026_v16 = vpop.f32.mrb[5].mxu0 }
 0x31e   : > { %v1220_v17 = vadd.f32 %v4886_v13, %v1213_v15 }
 0x320   : > { %1222 = vst.msk [vmem:[%s4891_s27] sm:$0xff] %vm1221_vm4, %v1220_v17  ;;  %v1223_v18 = vsel %vm1221_vm4, %v1220_v17, -inf }
 0x321   : > { %1224 = vmax.xlane.f32.xlu1 %v1223_v18 }
 0x323   : > { %v1388_v19 = vpop.f32.mrb[6].mxu0 }
 0x324   : > { %v4042_v21 = vpop.f32.mrb[7].mxu0  ;;  %v1389_v47 = vadd.f32 %v3709_v43, %v1388_v19 }
 0x32b   : > { %v1554_v22 = vpop.f32.mrb[8].mxu0 }
 0x32c   : > { %v4064_v23 = vpop.f32.mrb[9].mxu0  ;;  %v1555_v48 = vadd.f32 %v3723_v46, %v1554_v22 }
 0x32d   : > { %v1909_v23 = vld [vmem:[%s5381_s14] sm:$0xff] }
 0x3ae   : > { %v1225_v24 = vpop.xlane.xlu1 %1224 }
 0x3af   : > { %v1226_v25 = vsub.f32 %v1220_v17, %v1225_v24  ;;  %v1910_v24 = vld [vmem:[%s5381_s14 + $0x8] sm:$0xff] }
 0x3b1   : > { %v1227_v26 = vmul.f32 1.442695, %v1226_v25  ;;  %v4320_v25 = vpack.c.bf16 %v1910_v24, %v1909_v23  ;;  %v3760_v23 = vld [vmem:[%s5439_s1 + $0x58] sm:$0xff] }
 0x3b3   : > { %4454 = vpow2.f32 %v1227_v26  ;;  %v1912_v26 = vld [vmem:[%s5381_s14 + $0x18] sm:$0xff] }
 0x3bd   : > { %v4455_v27 = vpop.eup %4454 }
 0x3be   : > { %v1229_v28 = vsel %vm1221_vm4, %v4455_v27, 0.0 }
 0x3bf   : > { %1230 = vadd.xlane.f32.xlu1 %v1229_v28 }
 0x44c   : > { %v1231_v29 = vpop.xlane.xlu1 %1230 }
 0x44d   : > { %4456 = vrcp.f32 %v1231_v29 }
 0x457   : > { %v4457_v32 = vpop.eup %4456 }
 0x458   : > { %v1233_v34 = vmul.f32 %v4457_v32, %v4455_v27  ;;  %v3734_v32 = vld [vmem:[%s5379_s12] ss:$0 sm:$0xff] }
 0x45a   : > { %4030 = vmatmul.mubr.msk.f32.vlgmr.msra.gmra.mrb[4].mxu1 %vm1221_vm4, %v1233_v34  ;;  %v3735_v34 = vld [vmem:[%s5380_s13] ss:$0 sm:$0xff] }
 0x45b   : > { %4303 = vmatpush3.bf16.msra.mxu1 %v4302_v33  ;;  %4051 = vmatprep.mubr.msk.f32.mxu1 %vm4547_vm1, %v4548_v20 }
 0x45c   : > { %4304 = vmatprep.subr.bf16.mxu1 %v4546_v12 }
 0x45f   : > { %4306 = vmatpush3.bf16.msra.mxu1 %v4305_v38  ;;  %v2002_v38 = vld [vmem:[%s5383_s16] sm:$0xff] }
 0x460   : > { %4065 = vmatprep.subr.mxu1 %v4548_v20 }
 0x462   : > { %4052 = vmatmul.mubr.msk.f32.vlgmr.msra.gmra.mrb[6].mxu1 %vm775_vm0, %v4788_v36 }
 0x463   : > { %4067 = vmatprep.mubr.msk.f32.mxu1 %vm4547_vm1, %v4548_v20 }
 0x52d   : > { %v1303_v39 = vpop.f32.mrb[4].mxu1 }
 0x52e   : > { %v4031_v40 = vpop.f32.mrb[5].mxu1 }
 0x535   : > { %v1471_v42 = vpop.f32.mrb[6].mxu1 }
 0x536   : > { %v1472_v44 = vadd.f32 %v3716_v41, %v1471_v42  ;;  %v4053_v45 = vpop.f32.mrb[7].mxu1  ;;  %v2004_v41 = vld [vmem:[%s5383_s16 + $0x10] sm:$0xff]  ;;  %v2005_v42 = vld [vmem:[%s5383_s16 + $0x18] sm:$0xff] }
 0x537   : > { %v4329_v43 = vpack.c.bf16 %v2005_v42, %v2004_v41  ;;  %v2007_v45 = vld [vmem:[%s5383_s16 + $0x28] sm:$0xff] }
 0x538   : > { %4066 = vmatpush3.xpose.msk.msra.mxu1 %vm1136_vm3, %v1472_v44  ;;  %v2006_v44 = vld [vmem:[%s5383_s16 + $0x20] sm:$0xff]  ;;  %v3765_v41 = vld [vmem:[%s5440_s22 + $0x48] sm:$0xff] }
 0x539   : > { %4070 = vmatprep.subr.mxu1 %v4548_v20  ;;  %v4332_v46 = vpack.c.bf16 %v2007_v45, %v2006_v44  ;;  %v3767_v44 = vld [vmem:[%s5440_s22 + $0x58] sm:$0xff] }
 0x53b   : > { %4068 = vmatmul.mubr.msk.f32.vlgmr.msra.gmra.mrb[8].mxu1 %vm1136_vm3, %v1389_v47  ;;  %v2008_v47 = vld [vmem:[%s5383_s16 + $0x30] sm:$0xff] }
 0x53c   : > { %4071 = vmatpush3.msra.mxu1 %v1555_v48  ;;  %4072 = vmatprep.mubr.msk.f32.mxu1 %vm4547_vm1, %v4548_v20  ;;  %v2009_v48 = vld [vmem:[%s5383_s16 + $0x38] sm:$0xff] }
 0x53d   : > { %4316 = vmatprep.subr.bf16.mxu1 %v4546_v12 }
 0x60e   : > { %v1630_v49 = vpop.f32.mrb[8].mxu1 }
 0x60f   : > { %v1634_v50 = vmul.f32 0.25, %v1630_v49  ;;  %v4069_v51 = vpop.f32.mrb[9].mxu1  ;;  %v4335_v49 = vpack.c.bf16 %v2009_v48, %v2008_v47  ;;  %v3778_v47 = vld [vmem:[%s5437_s2 + $0x68] sm:$0xff] }
 0x611   : > { %v1635_v52 = vadd.f32 %v1634_v50, %v4886_v13  ;;  %v3736_v50 = vld [vmem:[%s5382_s15] ss:$0 sm:$0xff] }
 0x613   : > { %3727 = vst.msk [vmem:[%s4891_s27 + $0x8] sm:$0xff] %vm1221_vm4, %v1635_v52  ;;  %v1638_v53 = vsel %vm1221_vm4, %v1635_v52, -inf }
 0x614   : > { %1639 = vmax.xlane.f32.xlu0 %v1638_v53 }
 0x6a1   : > { %v1640_v54 = vpop.xlane.xlu0 %1639 }
 0x6a2   : > { %v1641_v55 = vsub.f32 %v1635_v52, %v1640_v54 }
 0x6a4   : > { %v1642_v56 = vmul.f32 1.442695, %v1641_v55 }
 0x6a6   : > { %4458 = vpow2.f32 %v1642_v56 }
 0x6b0   : > { %v4459_v57 = vpop.eup %4458 }
 0x6b1   : > { %v1644_v58 = vsel %vm1221_vm4, %v4459_v57, 0.0 }
 0x6b2   : > { %1645 = vadd.xlane.f32.xlu1 %v1644_v58 }
 0x73f   : > { %v1646_v62 = vpop.xlane.xlu1 %1645 }
 0x740   : > { %4460 = vrcp.f32 %v1646_v62 }
 0x74a   : > { %v4461_v1 = vpop.eup %4460 }
 0x74b   : > { %v1648_v3 = vmul.f32 %v4461_v1, %v4459_v57 }
 0x74d   : > { %4073 = vmatmul.mubr.msk.f32.vlgmr.msra.gmra.mrb[10].mxu1 %vm1221_vm4, %v1648_v3 }
 0x74e   : > { %4318 = vmatpush3.bf16.msra.mxu1 %v4317_v2  ;;  %4086 = vmatprep.mubr.msk.f32.mxu1 %vm4547_vm1, %v4548_v20 }
 0x74f   : > { %4325 = vmatprep.subr.bf16.mxu1 %v4546_v12 }
 0x751   : > { %4087 = vmatmul.mubr.msk.f32.vlgmr.msra.gmra.mrb[12].mxu1 %vm1136_vm3, %v1303_v39  ;;  %v2003_v39 = vld [vmem:[%s5383_s16 + $0x8] sm:$0xff] }
 0x752   : > { %4116 = vmatprep.mubr.msk.f32.mxu1 %vm4547_vm1, %v4548_v20  ;;  %v4326_v40 = vpack.c.bf16 %v2003_v39, %v2002_v38  ;;  %v3753_v38 = vld [vmem:[%s5437_s2 + $0x58] sm:$0xff] }
 0x754   : > { %4327 = vmatpush3.bf16.msra.mxu1 %v4326_v40  ;;  %v3764_v40 = vld [vmem:[%s5440_s22 + $0x40] sm:$0xff] }
 0x755   : > { %4328 = vmatprep.subr.bf16.mxu1 %v4546_v12  ;;  %v4356_v42 = vpack.c.bf16 %v3765_v41, %v3764_v40  ;;  %v3782_v41 = vld [vmem:[%s5447_s21 + $0x3] ss:$0 sm:$0xff] }
 0x758   : > { %4330 = vmatpush3.bf16.msra.mxu1 %v4329_v43  ;;  %v3766_v43 = vld [vmem:[%s5440_s22 + $0x50] sm:$0xff] }
 0x759   : > { %4331 = vmatprep.subr.bf16.mxu1 %v4546_v12  ;;  %v4359_v45 = vpack.c.bf16 %v3767_v44, %v3766_v43  ;;  %v3796_v44 = vld [vmem:[%s5446_s9 + $0x3] ss:$0 sm:$0xff] }
 0x75c   : > { %4333 = vmatpush3.bf16.msra.mxu1 %v4332_v46  ;;  %v3777_v46 = vld [vmem:[%s5437_s2 + $0x60] sm:$0xff] }
 0x75d   : > { %4334 = vmatprep.subr.bf16.mxu1 %v4546_v12  ;;  %v4362_v48 = vpack.c.bf16 %v3778_v47, %v3777_v46 }
 0x760   : > { %4336 = vmatpush3.bf16.msra.mxu1 %v4335_v49  ;;  %v3779_v49 = vld [vmem:[%s5437_s2 + $0x70] sm:$0xff] }
 0x761   : > { %4349 = vmatprep.subr.bf16.mxu1 %v4546_v12 }
 0x820   : > { %v1718_v4 = vpop.f32.mrb[10].mxu1 }
 0x821   : > { %v4074_v5 = vpop.f32.mrb[11].mxu1  ;;  %4080 = vmatmul.mubr.msk.f32.vlgmr.msra.gmra.mrb[10].mxu0 %vm1136_vm3, %v1718_v4 }
 0x822   : > { %4097 = vmatprep.mubr.msk.f32.mxu0 %vm4547_vm1, %v4548_v20  ;;  %4321 = vmatpush3.bf16.msra.mxu0 %v4320_v25 }
 0x823   : > { %4322 = vmatprep.subr.bf16.mxu0 %v4546_v12 }
 0x824   : > { %v1867_v6 = vpop.f32.mrb[12].mxu1 }
 0x825   : > { %v4088_v7 = vpop.f32.mrb[13].mxu1 }
 0x8f4   : > { %v1794_v8 = vpop.f32.mrb[10].mxu0 }
 0x8f5   : > { %v1868_v10 = vadd.f32 %v1867_v6, %v1794_v8  ;;  %v4081_v11 = vpop.f32.mrb[11].mxu0 }
 0x8f6   : > { %v3743_v11 = vld [vmem:[%s5387_s20 + $0x28] sm:$0xff] }
 0x8f7   : > { %v1878_v14 = vadd.f32 %v3733_v9, %v1868_v10  ;;  %v3742_v10 = vld [vmem:[%s5387_s20 + $0x20] sm:$0xff] }
 0x8f9   : > { %v1879_v15 = vadd.f32 %v1878_v14, %v4788_v36  ;;  %v1911_v36 = vld [vmem:[%s5381_s14 + $0x10] sm:$0xff]  ;;  %v4338_v14 = vpack.c.bf16 %v3743_v11, %v3742_v10 }
 0x8fa   : > { %v4323_v27 = vpack.c.bf16 %v1912_v26, %v1911_v36 }
 0x8fb   : > { %v1882_v16 = vsel %vm775_vm0, %v1879_v15, 0.0 }
 0x8fc   : > { %1883 = vadd.xlane.f32.xlu0 %v1882_v16  ;;  %4324 = vmatpush3.bf16.msra.mxu0 %v4323_v27  ;;  %v3758_v16 = vld [vmem:[%s5439_s1 + $0x48] sm:$0xff] }
 0x8fd   : > { %4337 = vmatprep.subr.bf16.mxu0 %v4546_v12 }
 0x989   : > { %v1884_v17 = vpop.xlane.xlu0 %1883 }
 0x98a   : > { %v1885_v18 = vmul.f32 0.03125, %v1884_v17 }
 0x98c   : > { %v1886_v19 = vsub.f32 %v1879_v15, %v1885_v18  ;;  %v3757_v15 = vld [vmem:[%s5439_s1 + $0x40] sm:$0xff]  ;;  %v3744_v18 = vld [vmem:[%s5387_s20 + $0x30] sm:$0xff] }
 0x98d   : > { %v4350_v17 = vpack.c.bf16 %v3758_v16, %v3757_v15 }
 0x98e   : > { %v1887_v21 = vmul.f32 %v1886_v19, %v1886_v19 }
 0x990   : > { %v1888_v22 = vsel %vm775_vm0, %v1887_v21, 0.0 }
 0x991   : > { %1889 = vadd.xlane.f32.xlu1 %v1888_v22  ;;  %v3759_v22 = vld [vmem:[%s5439_s1 + $0x50] sm:$0xff] }
 0x992   : > { %v4353_v24 = vpack.c.bf16 %v3760_v23, %v3759_v22 }
 0xa1e   : > { %v1890_v28 = vpop.xlane.xlu1 %1889 }
 0xa1f   : > { %v1891_v29 = vmul.f32 0.03125, %v1890_v28  ;;  %v3740_v28 = vld [vmem:[%s5385_s18] ss:$0 sm:$0xff] }
 0xa21   : > { %v1892_v30 = vadd.f32 1e-12, %v1891_v29 }
 0xa23   : > { %4462 = vrsqrt.f32 %v1892_v30  ;;  %v3750_v30 = vld [vmem:[%s5437_s2 + $0x40] sm:$0xff] }
 0xa2d   : > { %v4463_v31 = vpop.eup %4462 }
 0xa2e   : > { %v1894_v33 = vmul.f32 %v4463_v31, %v1886_v19  ;;  %v3745_v19 = vld [vmem:[%s5387_s20 + $0x38] sm:$0xff]  ;;  %v3751_v31 = vld [vmem:[%s5437_s2 + $0x48] sm:$0xff] }
 0xa2f   : > { %v4341_v21 = vpack.c.bf16 %v3745_v19, %v3744_v18 }
 0xa30   : > { %v1901_v35 = vmul.f32 %v3734_v32, %v1894_v33  ;;  %v3741_v32 = vld [vmem:[%s5386_s19] ss:$0 sm:$0xff] }
 0xa32   : > { %v1908_v37 = vadd.f32 %v3735_v34, %v1901_v35  ;;  %v4344_v34 = vpack.c.bf16 %v3751_v31, %v3750_v30 }
 0xa34   : > { %4098 = vmatmul.mubr.msk.f32.vlgmr.msra.gmra.mrb[12].mxu0 %vm775_vm0, %v1908_v37 }
 0xa35   : > { %4127 = vmatprep.mubr.msk.f32.mxu0 %vm4547_vm1, %v4548_v20  ;;  %4339 = vmatpush3.bf16.msra.mxu0 %v4338_v14 }
 0xa36   : > { %4340 = vmatprep.subr.bf16.mxu0 %v4546_v12 }
 0xa39   : > { %4342 = vmatpush3.bf16.msra.mxu0 %v4341_v21 }
 0xa3a   : > { %4343 = vmatprep.subr.bf16.mxu0 %v4546_v12 }
 0xb07   : > { %v1989_v51 = vpop.f32.mrb[12].mxu0 }
 0xb08   : > { %v1990_v52 = vadd.f32 %v3736_v50, %v1989_v51  ;;  %v4099_v53 = vpop.f32.mrb[13].mxu0  ;;  %v3780_v50 = vld [vmem:[%s5437_s2 + $0x78] sm:$0xff] }
 0xb09   : > { %v4365_v51 = vpack.c.bf16 %v3780_v50, %v3779_v49  ;;  %v3792_v53 = vld [vmem:[%s5440_s22 + $0x68] sm:$0xff] }
 0xb0a   : > { %v1994_v54 = vmul.f32 0.044715, %v1990_v52  ;;  %v1993_v60 = vmul.f32 0.5, %v1990_v52 }
 0xb0c   : > { %v1995_v55 = vmul.f32 %v1994_v54, %v1990_v52 }
 0xb0e   : > { %v1996_v56 = vmul.f32 %v1995_v55, %v1990_v52  ;;  %v3793_v55 = vld [vmem:[%s5440_s22 + $0x70] sm:$0xff] }
 0xb10   : > { %v1997_v57 = vadd.f32 %v1996_v56, %v1990_v52  ;;  %v3791_v52 = vld [vmem:[%s5440_s22 + $0x60] sm:$0xff]  ;;  %v3794_v56 = vld [vmem:[%s5440_s22 + $0x78] sm:$0xff] }
 0xb11   : > { %v4374_v54 = vpack.c.bf16 %v3792_v53, %v3791_v52 }
 0xb12   : > { %v1998_v58 = vmul.f32 0.7978846, %v1997_v57  ;;  %v4377_v57 = vpack.c.bf16 %v3794_v56, %v3793_v55 }
 0xb14   : > { %4464 = vtanh.f32 %v1998_v58  ;;  %v3747_v58 = vld [vmem:[%s5449_s8 + $0x1] ss:$0 sm:$0xff] }
 0xb1e   : > { %v4465_v59 = vpop.eup %4464 }
 0xb1f   : > { %v2000_v61 = vadd.f32 1.0, %v4465_v59  ;;  %v3762_v59 = vld [vmem:[%s5445_s6 + $0x2] ss:$0 sm:$0xff] }
 0xb21   : > { %v2001_v62 = vmul.f32 %v2000_v61, %v1993_v60 }
 0xb23   : > { %4117 = vmatmul.mubr.msk.f32.vlgmr.msra.gmra.mrb[14].mxu1 %vm2017_vm5, %v2001_v62 }
 0xb24   : > { %4149 = vmatprep.mubr.msk.f32.mxu1 %vm4547_vm1, %v4548_v20  ;;  %4351 = vmatpush3.bf16.msra.mxu1 %v4350_v17 }
 0xb25   : > { %4352 = vmatprep.subr.bf16.mxu1 %v4546_v12 }
 0xb28   : > { %4354 = vmatpush3.bf16.msra.mxu1 %v4353_v24 }
 0xb29   : > { %4163 = vmatprep.subr.mxu1 %v4548_v20 }
 0xbf6   : > { %v2087_v0 = vpop.f32.mrb[14].mxu1 }
 0xbf7   : > { %v2088_v1 = vadd.f32 %v3738_v63, %v2087_v0  ;;  %v4118_v2 = vpop.f32.mrb[15].mxu1 }
 0xbf8   : > { %v3755_v2 = vld [vmem:[%s5447_s21 + $0x2] ss:$0 sm:$0xff] }
 0xbf9   : > { %v2091_v3 = vadd.f32 %v2088_v1, %v1908_v37  ;;  %v3752_v37 = vld [vmem:[%s5437_s2 + $0x50] sm:$0xff] }
 0xbfa   : > { %v4347_v39 = vpack.c.bf16 %v3753_v38, %v3752_v37 }
 0xbfb   : > { %v2094_v4 = vsel %vm775_vm0, %v2091_v3, 0.0 }
 0xbfc   : > { %2095 = vadd.xlane.f32.xlu0 %v2094_v4 }
 0xc89   : > { %v2096_v5 = vpop.xlane.xlu0 %2095 }
 0xc8a   : > { %v2097_v6 = vmul.f32 0.03125, %v2096_v5 }
 0xc8c   : > { %v2098_v7 = vsub.f32 %v2091_v3, %v2097_v6  ;;  %v3769_v6 = vld [vmem:[%s5446_s9 + $0x2] ss:$0 sm:$0xff]  ;;  %s4482_s9 = scalar_lea.vmem %s3559_s3, 128 }
 0xc8d   : > { %p4483_p11 = scmp.ne.s32.totalorder %s3559_s3, %s4482_s9 }
 0xc8e   : > { %v2099_v8 = vmul.f32 %v2098_v7, %v2098_v7 }
 0xc8f   : > { %p4484_p12 = pnand %p4483_p11, %p4713_p5 }
 0xc90   : > { %v2100_v9 = vsel %vm775_vm0, %v2099_v8, 0.0 }
 0xc91   : > { %2101 = vadd.xlane.f32.xlu1 %v2100_v9  ;;  %p4485_p13 = pneg %p4484_p12 }
 0xd1e   : > { %v2102_v25 = vpop.xlane.xlu1 %2101 }
 0xd1f   : > { %v2103_v36 = vmul.f32 0.03125, %v2102_v25 }
 0xd21   : > { %v2104_v26 = vadd.f32 1e-12, %v2103_v36 }
 0xd23   : > { %4466 = vrsqrt.f32 %v2104_v26 }
 0xd2d   : > { %v4467_v27 = vpop.eup %4466 }
 0xd2e   : > { %v2106_v29 = vmul.f32 %v4467_v27, %v2098_v7  ;;  %v3784_v27 = vld [vmem:[%s5439_s1 + $0x60] sm:$0xff] }
 0xd30   : > { %v2113_v33 = vmul.f32 %v3740_v28, %v2106_v29  ;;  %v3785_v28 = vld [vmem:[%s5439_s1 + $0x68] sm:$0xff] }
 0xd31   : > { %v4368_v30 = vpack.c.bf16 %v3785_v28, %v3784_v27  ;;  %v3810_v28 = vld [vmem:[%s5379_s12 + $0x1] ss:$0 sm:$0xff] }
 0xd32   : > { %v5070_v35 = vadd.f32 %v3741_v32, %v2113_v33  ;;  %v3786_v32 = vld [vmem:[%s5439_s1 + $0x70] sm:$0xff]  ;;  %v3787_v33 = vld [vmem:[%s5439_s1 + $0x78] sm:$0xff] }
 0xd34   : > { %4128 = vmatmul.mubr.msk.f32.vlgmr.msra.gmra.mrb[14].mxu0 %vm775_vm0, %v5070_v35  ;;  %4150 = vmatmul.mubr.msk.f32.vlgmr.msra.gmra.mrb[16].mxu1 %vm775_vm0, %v5070_v35 }
 0xd35   : > { %4345 = vmatpush3.bf16.msra.mxu0 %v4344_v34  ;;  %4138 = vmatprep.mubr.msk.f32.mxu0 %vm4547_vm1, %v4548_v20  ;;  %v4371_v34 = vpack.c.bf16 %v3787_v33, %v3786_v32  ;;  %v3819_v33 = vld [vmem:[%s5383_s16 + $0x40] sm:$0xff] }
 0xd36   : > { %4346 = vmatprep.subr.bf16.mxu0 %v4546_v12  ;;  %4165 = vmatprep.mubr.msk.f32.mxu1 %vm4547_vm1, %v4548_v20 }
 0xd39   : > { %4348 = vmatpush3.bf16.msra.mxu0 %v4347_v39  ;;  %v3789_v39 = vld [vmem:[%s5445_s6 + $0x3] ss:$0 sm:$0xff]  ;;  %s3535_s6 = scalar_lea.sflag [#allocation3], %s738_s26 }
 0xd3a   : > { %4355 = vmatprep.subr.bf16.mxu0 %v4546_v12 }
 0xd3c   : > { %4139 = vmatmul.mubr.msk.f32.vlgmr.msra.gmra.mrb[16].mxu0 %vm775_vm0, %v5070_v35 }
 0xd3d   : > { %4357 = vmatpush3.bf16.msra.mxu0 %v4356_v42  ;;  %4160 = vmatprep.mubr.msk.f32.mxu0 %vm4547_vm1, %v4548_v20 }
 0xd3e   : > { %4358 = vmatprep.subr.bf16.mxu0 %v4546_v12 }
 0xd41   : > { %4360 = vmatpush3.bf16.msra.mxu0 %v4359_v45 }
 0xd42   : > { %4361 = vmatprep.subr.bf16.mxu0 %v4546_v12 }
 0xd44   : > { %4161 = vmatmul.mubr.msk.f32.vlgmr.msra.gmra.mrb[18].mxu0 %vm775_vm0, %v5070_v35 }
 0xd45   : > { %4363 = vmatpush3.bf16.msra.mxu0 %v4362_v48  ;;  %4181 = vmatprep.mubr.msk.f32.mxu0 %vm4547_vm1, %v4548_v20 }
 0xd46   : > { %4364 = vmatprep.subr.bf16.mxu0 %v4546_v12 }
 0xd49   : > { %4366 = vmatpush3.bf16.msra.mxu0 %v4365_v51 }
 0xd4a   : > { %4373 = vmatprep.subr.bf16.mxu0 %v4546_v12 }
 0xd4c   : > { %4182 = vmatmul.mubr.msk.f32.vlgmr.msra.gmra.mrb[20].mxu0 %vm775_vm0, %v5070_v35 }
 0xd4d   : > { %4375 = vmatpush3.bf16.msra.mxu0 %v4374_v54  ;;  %4203 = vmatprep.mubr.msk.f32.mxu0 %vm4547_vm1, %v4548_v20 }
 0xd4e   : > { %4376 = vmatprep.subr.bf16.mxu0 %v4546_v12 }
 0xd51   : > { %4378 = vmatpush3.bf16.msra.mxu0 %v4377_v57  ;;  %v3802_v57 = vld [vmem:[%s5377_s10 + $0x30] sm:$0xff] }
 0xd52   : > { %4379 = vmatprep.subr.bf16.mxu0 %v4546_v12 }
 0xd54   : > { %4204 = vmatmul.mubr.msk.f32.vlgmr.msra.gmra.mrb[22].mxu0 %vm775_vm0, %v5070_v35 }
 0xd55   : > { %4220 = vmatprep.mubr.msk.f32.mxu0 %vm4547_vm1, %v4548_v20 }
 0xe07   : > { %v2203_v60 = vpop.f32.mrb[14].mxu0  ;;  %v2371_v61 = vpop.f32.mrb[16].mxu1 }
 0xe08   : > { %v2204_v62 = vadd.f32 %v3747_v58, %v2203_v60  ;;  %v2372_v63 = vadd.f32 %v3762_v59, %v2371_v61  ;;  %v4129_v0 = vpop.f32.mrb[15].mxu0  ;;  %v4151_v1 = vpop.f32.mrb[17].mxu1  ;;  %v3775_v60 = vld [vmem:[%s5377_s10 + $0x20] sm:$0xff]  ;;  %v3776_v61 = vld [vmem:[%s5377_s10 + $0x28] sm:$0xff] }
 0xe0a   : > { %3749 = vst.msk [vmem:[%s4826_s25 + $0x8] sm:$0xff] %vm891_vm2, %v2204_v62  ;;  %4164 = vmatpush3.xpose.msk.msra.mxu1 %vm1136_vm3, %v2372_v63  ;;  %v4383_v63 = vpack.c.bf16 %v3776_v61, %v3775_v60 }
 0xe0b   : > { %4168 = vmatprep.subr.mxu1 %v4548_v20 }
 0xe0f   : > { %v2288_v3 = vpop.f32.mrb[16].mxu0 }
 0xe10   : > { %v2289_v4 = vadd.f32 %v3755_v2, %v2288_v3  ;;  %v4140_v5 = vpop.f32.mrb[17].mxu0 }
 0xe12   : > { %4166 = vmatmul.mubr.msk.f32.vlgmr.msra.gmra.mrb[18].mxu1 %vm1136_vm3, %v2289_v4 }
 0xe13   : > { %4170 = vmatprep.mubr.msk.f32.mxu1 %vm4547_vm1, %v4548_v20 }
 0xe17   : > { %v2454_v7 = vpop.f32.mrb[18].mxu0 }
 0xe18   : > { %v2455_v8 = vadd.f32 %v3769_v6, %v2454_v7  ;;  %v4162_v9 = vpop.f32.mrb[19].mxu0  ;;  %v3807_v6 = vld [vmem:[%s5378_s11 + $0x1] ss:$0 sm:$0xff] }
 0xe1a   : > { %4169 = vmatpush3.msra.mxu1 %v2455_v8 }
 0xe1b   : > { %4367 = vmatprep.subr.bf16.mxu1 %v4546_v12 }
 0xe1f   : > { %v2704_v10 = vpop.f32.mrb[20].mxu0 }
 0xe20   : > { %v4183_v11 = vpop.f32.mrb[21].mxu0  ;;  %v2705_v45 = vadd.f32 %v3782_v41, %v2704_v10  ;;  %v3824_v41 = vld [vmem:[%s5383_s16 + $0x68] sm:$0xff] }
 0xe27   : > { %v2870_v14 = vpop.f32.mrb[22].mxu0 }
 0xe28   : > { %v4205_v15 = vpop.f32.mrb[23].mxu0  ;;  %v2871_v46 = vadd.f32 %v3796_v44, %v2870_v14  ;;  %v3826_v44 = vld [vmem:[%s5383_s16 + $0x78] sm:$0xff] }
 0xee5   : > { %v2530_v16 = vpop.f32.mrb[18].mxu1 }
 0xee6   : > { %v2534_v17 = vmul.f32 0.25, %v2530_v16  ;;  %v4167_v18 = vpop.f32.mrb[19].mxu1 }
 0xee8   : > { %v2535_v19 = vadd.f32 %v2534_v17, %v4886_v13 }
 0xeea   : > { %3773 = vst.msk [vmem:[%s4891_s27 + $0x10] sm:$0xff] %vm1221_vm4, %v2535_v19  ;;  %v2538_v21 = vsel %vm1221_vm4, %v2535_v19, -inf }
 0xeeb   : > { %2539 = vmax.xlane.f32.xlu0 %v2538_v21  ;;  %v3813_v21 = vld [vmem:[%s5381_s14 + $0x28] sm:$0xff] }
 0xf78   : > { %v2540_v22 = vpop.xlane.xlu0 %2539 }
 0xf79   : > { %v2541_v23 = vsub.f32 %v2535_v19, %v2540_v22  ;;  %v3812_v19 = vld [vmem:[%s5381_s14 + $0x20] sm:$0xff] }
 0xf7a   : > { %v4386_v22 = vpack.c.bf16 %v3813_v21, %v3812_v19 }
 0xf7b   : > { %v2542_v24 = vmul.f32 1.442695, %v2541_v23  ;;  %v3815_v23 = vld [vmem:[%s5381_s14 + $0x38] sm:$0xff] }
 0xf7d   : > { %4468 = vpow2.f32 %v2542_v24 }
 0xf87   : > { %v4469_v25 = vpop.eup %4468 }
 0xf88   : > { %v2544_v36 = vsel %vm1221_vm4, %v4469_v25, 0.0 }
 0xf89   : > { %2545 = vadd.xlane.f32.xlu1 %v2544_v36 }
0x1016   : > { %v2546_v26 = vpop.xlane.xlu1 %2545 }
0x1017   : > { %4470 = vrcp.f32 %v2546_v26 }
0x1021   : > { %v4471_v29 = vpop.eup %4470 }
0x1022   : > { %v2548_v31 = vmul.f32 %v4471_v29, %v4469_v25 }
0x1024   : > { %4171 = vmatmul.mubr.msk.f32.vlgmr.msra.gmra.mrb[20].mxu1 %vm1221_vm4, %v2548_v31 }
0x1025   : > { %4369 = vmatpush3.bf16.msra.mxu1 %v4368_v30  ;;  %4192 = vmatprep.mubr.msk.f32.mxu1 %vm4547_vm1, %v4548_v20  ;;  %v3811_v30 = vld [vmem:[%s5380_s13 + $0x1] ss:$0 sm:$0xff] }
0x1026   : > { %4370 = vmatprep.subr.bf16.mxu1 %v4546_v12 }
0x1029   : > { %4372 = vmatpush3.bf16.msra.mxu1 %v4371_v34  ;;  %v3820_v34 = vld [vmem:[%s5383_s16 + $0x48] sm:$0xff] }
0x102a   : > { %4206 = vmatprep.subr.mxu1 %v4548_v20 }
0x102c   : > { %4193 = vmatmul.mubr.msk.f32.vlgmr.msra.gmra.mrb[22].mxu1 %vm775_vm0, %v5070_v35 }
0x102d   : > { %4208 = vmatprep.mubr.msk.f32.mxu1 %vm4547_vm1, %v4548_v20 }
0x10f7   : > { %v2618_v37 = vpop.f32.mrb[20].mxu1 }
0x10f8   : > { %v4172_v38 = vpop.f32.mrb[21].mxu1 }
0x10f9   : > { %v3821_v38 = vld [vmem:[%s5383_s16 + $0x50] sm:$0xff] }
0x10ff   : > { %v2787_v40 = vpop.f32.mrb[22].mxu1 }
0x1100   : > { %v2788_v42 = vadd.f32 %v3789_v39, %v2787_v40  ;;  %v4194_v43 = vpop.f32.mrb[23].mxu1  ;;  %v3822_v39 = vld [vmem:[%s5383_s16 + $0x58] sm:$0xff]  ;;  %v3823_v40 = vld [vmem:[%s5383_s16 + $0x60] sm:$0xff] }
0x1101   : > { %v3825_v43 = vld [vmem:[%s5383_s16 + $0x70] sm:$0xff] }
0x1102   : > { %4207 = vmatpush3.xpose.msk.msra.mxu1 %vm1136_vm3, %v2788_v42  ;;  %v4398_v42 = vpack.c.bf16 %v3824_v41, %v3823_v40 }
0x1103   : > { %4211 = vmatprep.subr.mxu1 %v4548_v20 }
0x1105   : > { %4209 = vmatmul.mubr.msk.f32.vlgmr.msra.gmra.mrb[24].mxu1 %vm1136_vm3, %v2705_v45  ;;  %v4401_v45 = vpack.c.bf16 %v3826_v44, %v3825_v43 }
0x1106   : > { %4212 = vmatpush3.msra.mxu1 %v2871_v46  ;;  %4213 = vmatprep.mubr.msk.f32.mxu1 %vm4547_vm1, %v4548_v20  ;;  %v3817_v46 = vld [vmem:[%s5382_s15 + $0x1] ss:$0 sm:$0xff] }
0x1107   : > { %4382 = vmatprep.subr.bf16.mxu1 %v4546_v12 }
0x11d8   : > { %v2946_v47 = vpop.f32.mrb[24].mxu1 }
0x11d9   : > { %v2950_v48 = vmul.f32 0.25, %v2946_v47  ;;  %v4210_v49 = vpop.f32.mrb[25].mxu1 }
0x11db   : > { %v2951_v50 = vadd.f32 %v2950_v48, %v4886_v13  ;;  %v3803_v13 = vld [vmem:[%s5377_s10 + $0x38] sm:$0xff] }
0x11dc   : > { %v4380_v58 = vpack.c.bf16 %v3803_v13, %v3802_v57 }
0x11dd   : > { %3800 = vst.msk [vmem:[%s4891_s27 + $0x18] sm:$0xff] %vm1221_vm4, %v2951_v50  ;;  %v2954_v51 = vsel %vm1221_vm4, %v2951_v50, -inf  ;;  %s4486_s27 = sshll.u32 %s4549_s5, 4  ;;  %s4487_s27 = int_to_ptr.vmem [resolvable:$false] %s4486_s27 }
0x11de   : > { %2955 = vmax.xlane.f32.xlu0 %v2954_v51  ;;  %4381 = vmatpush3.bf16.msra.mxu0 %v4380_v58  ;;  %v3828_v58 = vld [vmem:[%s5384_s17 + $0x1] ss:$0 sm:$0xff]  ;;  %s4488_s4 = scalar_lea.vmem %s4487_s27, 256  ;;  %p4489_p0 = scmp.lt.s32.totalorder %s3559_s3, %s4487_s27 }
0x11df   : > { %4385 = vmatprep.subr.bf16.mxu0 %v4546_v12  ;;  %p4490_p1 = scmp.lt.s32.totalorder %s4488_s4, %s4482_s9 }
0x11e1   : > { %p4491_p2 = por %p4490_p1, %p4489_p0 }
0x11e3   : > { %p4492_p3 = pnand %p4491_p2, %p4485_p13 }
0x126b   : > { %v2956_v52 = vpop.xlane.xlu0 %2955 }
0x126c   : > { %v2957_v53 = vsub.f32 %v2951_v50, %v2956_v52 }
0x126e   : > { %v2958_v54 = vmul.f32 1.442695, %v2957_v53 }
0x1270   : > { %4472 = vpow2.f32 %v2958_v54 }
0x127a   : > { %v4473_v55 = vpop.eup %4472 }
0x127b   : > { %v2960_v56 = vsel %vm1221_vm4, %v4473_v55, 0.0 }
0x127c   : > { %2961 = vadd.xlane.f32.xlu1 %v2960_v56 }
0x1309   : > { %v2962_v59 = vpop.xlane.xlu1 %2961 }
0x130a   : > { %4474 = vrcp.f32 %v2962_v59 }
0x1314   : > { %v4475_v62 = vpop.eup %4474 }
0x1315   : > { %v2964_v0 = vmul.f32 %v4475_v62, %v4473_v55 }
0x1317   : > { %4214 = vmatmul.mubr.msk.f32.vlgmr.msra.gmra.mrb[26].mxu1 %vm1221_vm4, %v2964_v0 }
0x1318   : > { %4384 = vmatpush3.bf16.msra.mxu1 %v4383_v63  ;;  %4227 = vmatprep.mubr.msk.f32.mxu1 %vm4547_vm1, %v4548_v20 }
0x1319   : > { %4391 = vmatprep.subr.bf16.mxu1 %v4546_v12 }
0x131b   : > { %4228 = vmatmul.mubr.msk.f32.vlgmr.msra.gmra.mrb[28].mxu1 %vm1136_vm3, %v2618_v37  ;;  %v4392_v37 = vpack.c.bf16 %v3820_v34, %v3819_v33 }
0x131c   : > { %4257 = vmatprep.mubr.msk.f32.mxu1 %vm4547_vm1, %v4548_v20 }
0x131d   : > { %4393 = vmatpush3.bf16.msra.mxu1 %v4392_v37 }
0x131e   : > { %4394 = vmatprep.subr.bf16.mxu1 %v4546_v12 }
0x13ea   : > { %v3034_v1 = vpop.f32.mrb[26].mxu1 }
0x13eb   : > { %v4215_v2 = vpop.f32.mrb[27].mxu1  ;;  %4221 = vmatmul.mubr.msk.f32.vlgmr.msra.gmra.mrb[24].mxu0 %vm1136_vm3, %v3034_v1 }
0x13ec   : > { %4238 = vmatprep.mubr.msk.f32.mxu0 %vm4547_vm1, %v4548_v20  ;;  %4387 = vmatpush3.bf16.msra.mxu0 %v4386_v22 }
0x13ed   : > { %4388 = vmatprep.subr.bf16.mxu0 %v4546_v12 }
0x13ee   : > { %v3183_v3 = vpop.f32.mrb[28].mxu1 }
0x13ef   : > { %v4229_v4 = vpop.f32.mrb[29].mxu1 }
0x14be   : > { %v3110_v5 = vpop.f32.mrb[24].mxu0 }
0x14bf   : > { %v3184_v7 = vadd.f32 %v3183_v3, %v3110_v5  ;;  %v4222_v8 = vpop.f32.mrb[25].mxu0  ;;  %v3834_v5 = vld [vmem:[%s5387_s20 + $0x40] sm:$0xff] }
0x14c0   : > { %v3836_v8 = vld [vmem:[%s5387_s20 + $0x50] sm:$0xff] }
0x14c1   : > { %v3195_v9 = vadd.f32 %v3807_v6, %v3184_v7  ;;  %v3835_v6 = vld [vmem:[%s5387_s20 + $0x48] sm:$0xff] }
0x14c2   : > { %v4404_v7 = vpack.c.bf16 %v3835_v6, %v3834_v5 }
0x14c3   : > { %v3196_v10 = vadd.f32 %v3195_v9, %v5070_v35  ;;  %v3814_v35 = vld [vmem:[%s5381_s14 + $0x30] sm:$0xff]  ;;  %v3837_v9 = vld [vmem:[%s5387_s20 + $0x58] sm:$0xff] }
0x14c4   : > { %v4389_v24 = vpack.c.bf16 %v3815_v23, %v3814_v35 }
0x14c5   : > { %v3201_v11 = vsel %vm775_vm0, %v3196_v10, 0.0 }
0x14c6   : > { %3202 = vadd.xlane.f32.xlu0 %v3201_v11  ;;  %4390 = vmatpush3.bf16.msra.mxu0 %v4389_v24 }
0x14c7   : > { %4403 = vmatprep.subr.bf16.mxu0 %v4546_v12 }
0x1553   : > { %v3203_v14 = vpop.xlane.xlu0 %3202 }
0x1554   : > { %v3204_v15 = vmul.f32 0.03125, %v3203_v14 }
0x1556   : > { %v3205_v16 = vsub.f32 %v3196_v10, %v3204_v15  ;;  %v4407_v10 = vpack.c.bf16 %v3837_v9, %v3836_v8 }
0x1558   : > { %v3206_v17 = vmul.f32 %v3205_v16, %v3205_v16 }
0x155a   : > { %v3207_v18 = vsel %vm775_vm0, %v3206_v17, 0.0 }
0x155b   : > { %3208 = vadd.xlane.f32.xlu1 %v3207_v18  ;;  %v3833_v18 = vld [vmem:[%s5386_s19 + $0x1] ss:$0 sm:$0xff] }
0x15e8   : > { %v3209_v25 = vpop.xlane.xlu1 %3208 }
0x15e9   : > { %v3210_v36 = vmul.f32 0.03125, %v3209_v25 }
0x15eb   : > { %v3211_v26 = vadd.f32 1e-12, %v3210_v36 }
0x15ed   : > { %4476 = vrsqrt.f32 %v3211_v26 }
0x15f7   : > { %v4477_v27 = vpop.eup %4476 }
0x15f8   : > { %v3213_v29 = vmul.f32 %v4477_v27, %v3205_v16 }
0x15fa   : > { %v3220_v31 = vmul.f32 %v3810_v28, %v3213_v29 }
0x15fc   : > { %v3227_v32 = vadd.f32 %v3811_v30, %v3220_v31 }
0x15fe   : > { %4239 = vmatmul.mubr.msk.f32.vlgmr.msra.gmra.mrb[26].mxu0 %vm775_vm0, %v3227_v32 }
0x15ff   : > { %4268 = vmatprep.mubr.msk.f32.mxu0 %vm4547_vm1, %v4548_v20  ;;  %v4395_v20 = vpack.c.bf16 %v3822_v39, %v3821_v38  ;;  %4405 = vmatpush3.bf16.msra.mxu0 %v4404_v7 }
0x1600   : > { %4406 = vmatprep.subr.bf16.mxu0 %v4546_v12 }
0x1601   : > { %4396 = vmatpush3.bf16.msra.mxu1 %v4395_v20 }
0x1602   : > { %4397 = vmatprep.subr.bf16.mxu1 %v4546_v12 }
0x1603   : > { %4408 = vmatpush3.bf16.msra.mxu0 %v4407_v10 }
0x1605   : > { %4399 = vmatpush3.bf16.msra.mxu1 %v4398_v42 }
0x1606   : > { %4400 = vmatprep.subr.bf16.mxu1 %v4546_v12  ;;  %v3832_v12 = vld [vmem:[%s5385_s18 + $0x1] ss:$0 sm:$0xff] }
0x1609   : > { %4402 = vmatpush3.bf16.msra.mxu1 %v4401_v45 }
0x16d1   : > { %v3310_v47 = vpop.f32.mrb[26].mxu0 }
0x16d2   : > { %v3311_v48 = vadd.f32 %v3817_v46, %v3310_v47  ;;  %v4240_v49 = vpop.f32.mrb[27].mxu0 }
0x16d4   : > { %v3315_v50 = vmul.f32 0.044715, %v3311_v48  ;;  %v3314_v56 = vmul.f32 0.5, %v3311_v48 }
0x16d6   : > { %v3316_v51 = vmul.f32 %v3315_v50, %v3311_v48 }
0x16d8   : > { %v3317_v52 = vmul.f32 %v3316_v51, %v3311_v48 }
0x16da   : > { %v3318_v53 = vadd.f32 %v3317_v52, %v3311_v48 }
0x16dc   : > { %v3319_v54 = vmul.f32 0.7978846, %v3318_v53 }
0x16de   : > { %4478 = vtanh.f32 %v3319_v54 }
0x16e8   : > { %v4479_v55 = vpop.eup %4478 }
0x16e9   : > { %v3321_v57 = vadd.f32 1.0, %v4479_v55 }
0x16eb   : > { %v3322_v13 = vmul.f32 %v3321_v57, %v3314_v56 }
0x16ed   : > { %4258 = vmatmul.mubr.msk.f32.vlgmr.msra.gmra.mrb[30].mxu1 %vm2017_vm5, %v3322_v13 }
0x17c0   : > { %v3409_v59 = vpop.f32.mrb[30].mxu1 }
0x17c1   : > { %v3410_v60 = vadd.f32 %v3828_v58, %v3409_v59  ;;  %v4259_v61 = vpop.f32.mrb[31].mxu1 }
0x17c3   : > { %v3413_v62 = vadd.f32 %v3410_v60, %v3227_v32 }
0x17c5   : > { %v3418_v63 = vsel %vm775_vm0, %v3413_v62, 0.0 }
0x17c6   : > { %3419 = vadd.xlane.f32.xlu0 %v3418_v63 }
0x1853   : > { %v3420_v0 = vpop.xlane.xlu0 %3419 }
0x1854   : > { %v3421_v1 = vmul.f32 0.03125, %v3420_v0 }
0x1856   : > { %v3422_v2 = vsub.f32 %v3413_v62, %v3421_v1 }
0x1858   : > { %v3423_v3 = vmul.f32 %v3422_v2, %v3422_v2 }
0x185a   : > { %v3424_v4 = vsel %vm775_vm0, %v3423_v3, 0.0 }
0x185b   : > { %3425 = vadd.xlane.f32.xlu1 %v3424_v4 }
0x18e8   : > { %v3426_v11 = vpop.xlane.xlu1 %3425 }
0x18e9   : > { %v3427_v14 = vmul.f32 0.03125, %v3426_v11 }
0x18eb   : > { %v3428_v15 = vadd.f32 1e-12, %v3427_v14 }
0x18ed   : > { %4480 = vrsqrt.f32 %v3428_v15 }
0x18f7   : > { %v4481_v16 = vpop.eup %4480 }
0x18f8   : > { %v3430_v17 = vmul.f32 %v4481_v16, %v3422_v2 }
0x18fa   : > { %v3437_v19 = vmul.f32 %v3832_v12, %v3430_v17 }
0x18fc   : > { %v3444_v21 = vadd.f32 %v3833_v18, %v3437_v19 }
0x18fe   : > { %4269 = vmatmul.mubr.msk.f32.vlgmr.msra.gmra.mrb[28].mxu0 %vm775_vm0, %v3444_v21  ;;  %3533 = vst.msk [vmem:[%s740_s28] sm:$0xff] %vm775_vm0, %v3444_v21 }
0x18ff   : > { %4495 = shalt.err (!%p4492_p3)
}
0x1900   : > { %s4496_s2 = scalar_lea.hbm %s5326_s29, 128  ;;  %s4500_s26 = scalar_lea.hbm %s5453_s7, 256 }
0x1901   : > { %p4497_p4 = scmp.ne.s32.totalorder %s5326_s29, %s4496_s2  ;;  %p4501_p9 = scmp.lt.u32.totalorder %s5326_s29, %s5453_s7 }
0x1902   : > { %p4502_p10 = scmp.lt.u32.totalorder %s4500_s26, %s4496_s2  ;;  %p4504_p12 = scmp.lt.u32.totalorder %s4496_s2, %s5326_s29 }
0x1903   : > { %p4498_p7 = pnand %p4497_p4, %p4713_p5 }
0x1904   : > { %p4503_p11 = por %p4502_p10, %p4501_p9 }
0x1905   : > { %p4499_p8 = pneg %p4498_p7 }
0x1906   : > { %p4505_p13 = por %p4504_p12, %p4503_p11 }
0x1908   : > { %p4506_p0 = pnand %p4505_p13, %p4499_p8 }
0x190a   : > { %4509 = shalt.err (!%p4506_p0)
}
0x190b   : > { %4410 = dma.vmem_to_hbm [thread:$0]  (%p4713_p5), %s3559_s3, 128, %s5326_s29, %s3535_s6   ;;  %v3839_v22 = vld [vmem:[%s5449_s8 + $0x2] ss:$0 sm:$0xff] }
0x19d1   : > { %v3527_v35 = vpop.f32.mrb[28].mxu0 }
0x19d2   : > { %v3528_v23 = vadd.f32 %v3839_v22, %v3527_v35  ;;  %v4270_v24 = vpop.f32.mrb[29].mxu0 }
0x19d4   : > { %3841 = vst.msk [vmem:[%s4826_s25 + $0x10] sm:$0xff] %vm891_vm2, %v3528_v23 }
0x19d5 PF: > { %s5454_s27 = sld [smem:[#allocation8_spill]]  ;;  %s5455_s4 = sld [smem:[#allocation5_spill]] }
0x19db   : > { %p4416_p1 = scmp.ge.s32.totalorder %s5454_s27, 2  ;;  %s3576_s1 = sand.u32 1, %s5455_s4  }
0x19dc   : > { %s3577_s30 = scalar_lea.sflag [#allocation3], %s3576_s1 }
0x19dd   : > { %p4413_p2 = pnand %p4416_p1, %p4717_p6 }
0x19df   : > { %4527 = dma.done.wait (!%p4413_p2), %s3577_s30, 128  }
0x19e0   : > { %4529 = vsyncadd (!%p4413_p2), %s3577_s30, 4294967168  ;;  %s5457_s28 = sld [smem:[#allocation10_spill]]  ;;  %s5458_s5 = sld [smem:[#allocation6_spill]] }
0x19e1   : > { %s5459_s26 = sld [smem:[#allocation7_spill]]  ;;  %s5460_s27 = sld [smem:[#allocation11_spill]] }
0x19e6   : > { %p35_p5 = scmp.ge.s32.totalorder %s5457_s28, 4  }
0x19e8   :  { %37 = sbr.rel (!%p35_p5) target bundleno = 17 (0x11), region = 209 }
0x19ef   :  { %3598 = vsyncpa [#allocation3], 1 }
0x19f0   :  { %3600 = vsyncpa [#allocation3 + $0x1], 1 }

</bundles_post_ra>
